<compile_context>
chip_gen: v5e
topology: v5e:2x2
jax: 0.10.0
libtpu: 0.0.40
codegen_flags: <defaults>
</compile_context>

<pallas_src>
import functools

import jax
import jax.numpy as jnp
from jax import lax
from jax.experimental import pallas as pl
from jax.experimental.pallas import tpu as pltpu


# ----------------------------------------------------------------------------
# helpers
# ----------------------------------------------------------------------------
def _pick_tile(n, max_lanes):
    """Largest multiple of 128 that divides n and is <= max_lanes (fallback: n)."""
    best = None
    top = min(n, max_lanes)
    for t in range(128, top + 1, 128):
        if n % t == 0:
            best = t
    return best if best is not None else n


def fold_bn(w, b, bn, out_axis=0, eps=1e-5):
    """Fold eval-mode BatchNorm3d into the preceding conv weight / bias."""
    s = bn["gamma"] / jnp.sqrt(bn["var"] + eps)
    shape = [1] * w.ndim
    shape[out_axis] = -1
    return w * s.reshape(shape), (b - bn["mean"]) * s + bn["beta"]


def conv3x3_to_27(w_pt):
    """PyTorch Conv3d weight (Cout, Cin, 3,3,3) -> (27, Cout, Cin), k = (kd*3+kh)*3+kw."""
    cout, cin = w_pt.shape[:2]
    return jnp.transpose(w_pt, (2, 3, 4, 0, 1)).reshape(27, cout, cin)


def convT2_to_rows(w_pt, b):
    """PyTorch ConvTranspose3d(k=2,s=2) weight (Cin,Cout,2,2,2) -> (8*Cout, Cin) rows ordered
    (kd, kh, kw, cout), plus the matching tiled bias."""
    cout = w_pt.shape[1]
    w8 = jnp.transpose(w_pt, (2, 3, 4, 1, 0)).reshape(8 * cout, w_pt.shape[0])
    return w8, jnp.tile(b, 8)


# ----------------------------------------------------------------------------
# K1: proj + attention gate + transposed-conv channel matmul (pointwise, fused)
# ----------------------------------------------------------------------------
def _proj_gate_up_kernel(x_ref, wp_ref, bp_ref, wa_ref, ba_ref, w8_ref, b8_ref, sp_ref,
                         o_ref):
    x = x_ref[0]                                                       # (Cemb, T)
    h = jnp.maximum(jnp.dot(wp_ref[...], x, preferred_element_type=jnp.float32)
                    + bp_ref[...], 0.0)
    a = jax.nn.sigmoid(jnp.dot(wa_ref[...], h, preferred_element_type=jnp.float32)
                       + ba_ref[...])
    g = h * (sp_ref[0, 0] + a)
    o_ref[0] = (jnp.dot(w8_ref[...], g, preferred_element_type=jnp.float32)
                + b8_ref[...]).astype(o_ref.dtype)


def fused_proj_gate_up(x, wp, bp, wa, ba, sp, w8, b8, max_block_bytes=4 * 1024 * 1024):
    """x: (B, Cemb, N) -> (B, 8*Cout, N).  BN folded into wp/bp and wa/ba."""
    bsz, cin, n = x.shape
    c8 = w8.shape[0]
    bytes_per_lane = (cin + c8) * 4
    tile = _pick_tile(n, max(128, max_block_bytes // bytes_per_lane))
    return pl.pallas_call(
        _proj_gate_up_kernel,
        out_shape=jax.ShapeDtypeStruct((bsz, c8, n), jnp.float32),
        grid=(bsz, n // tile),
        in_specs=[
            pl.BlockSpec((1, cin, tile), lambda b, i: (b, 0, i)),
            pl.BlockSpec((cin, cin), lambda b, i: (0, 0)),
            pl.BlockSpec((cin, 1), lambda b, i: (0, 0)),
            pl.BlockSpec((cin, cin), lambda b, i: (0, 0)),
            pl.BlockSpec((cin, 1), lambda b, i: (0, 0)),
            pl.BlockSpec((c8, cin), lambda b, i: (0, 0)),
            pl.BlockSpec((c8, 1), lambda b, i: (0, 0)),
            pl.BlockSpec((1, 1), lambda b, i: (0, 0)),
        ],
        out_specs=pl.BlockSpec((1, c8, tile), lambda b, i: (b, 0, i)),
        compiler_params=pltpu.CompilerParams(
            dimension_semantics=("parallel", "parallel")),
    )(x.astype(jnp.float32), wp, bp.reshape(cin, 1), wa, ba.reshape(cin, 1),
      w8, b8.reshape(c8, 1), sp.reshape(1, 1))


# ----------------------------------------------------------------------------
# K3: attention gate + transposed-conv channel matmul on (B, D, C, H*W) slabs
# ----------------------------------------------------------------------------
def _gate_up_kernel(x_ref, wa_ref, ba_ref, w8_ref, b8_ref, sp_ref, o_ref, *, nsub):
    wa = wa_ref[...]
    ba = ba_ref[...]
    w8 = w8_ref[...]
    b8 = b8_ref[...]
    sp = sp_ref[0, 0]
    for j in range(nsub):
        x = x_ref[0, j]                                                # (C, HW)
        a = jax.nn.sigmoid(jnp.dot(wa, x, preferred_element_type=jnp.float32) + ba)
        g = x * (sp + a)
        o_ref[0, j] = (jnp.dot(w8, g, preferred_element_type=jnp.float32)
                       + b8).astype(o_ref.dtype)


def fused_gate_up(x, wa, ba, sp, w8, b8):
    """x: (B, D, C, H*W) -> (B, D, 8*Cout, H*W)."""
    bsz, d, c, hw = x.shape
    c8 = w8.shape[0]
    dblk = next(dd for dd in (8, 6, 4, 3, 2, 1) if d % dd == 0)
    return pl.pallas_call(
        functools.partial(_gate_up_kernel, nsub=dblk),
        out_shape=jax.ShapeDtypeStruct((bsz, d, c8, hw), jnp.float32),
        grid=(bsz, d // dblk),
        in_specs=[
            pl.BlockSpec((1, dblk, c, hw), lambda b, t: (b, t, 0, 0)),
            pl.BlockSpec((c, c), lambda b, t: (0, 0)),
            pl.BlockSpec((c, 1), lambda b, t: (0, 0)),
            pl.BlockSpec((c8, c), lambda b, t: (0, 0)),
            pl.BlockSpec((c8, 1), lambda b, t: (0, 0)),
            pl.BlockSpec((1, 1), lambda b, t: (0, 0)),
        ],
        out_specs=pl.BlockSpec((1, dblk, c8, hw), lambda b, t: (b, t, 0, 0)),
        compiler_params=pltpu.CompilerParams(
            dimension_semantics=("parallel", "parallel")),
    )(x.astype(jnp.float32), wa, ba.reshape(c, 1), w8, b8.reshape(c8, 1),
      sp.reshape(1, 1))


# ----------------------------------------------------------------------------
# K2 / K4: 3x3x3 conv (pad=1) + folded BN + ReLU (+ optional fused 1x1 conv)
# ----------------------------------------------------------------------------
def _refine_kernel(*refs, h, w, d_total, db, apply_post):
    slabs = refs[:db + 2]
    w_ref, b_ref, pw_ref, pb_ref, col_ref, o_ref = refs[db + 2:]
    hw = h * w
    t = pl.program_id(1)

    # depth boundary: out-of-range slabs (index-map clamped) are zeroed here
    xs = []
    for k in range(db + 2):
        gd = t * db + (k - 1)
        ok = jnp.logical_and(gd >= 0, gd < d_total)
        xs.append(slabs[k][0, 0] * ok.astype(jnp.float32))

    # row / column validity masks on the flattened (h, w) lane axis
    q = lax.broadcasted_iota(jnp.int32, (1, hw), 1)
    col = col_ref[...]                                                 # (1, hw) f32 column id
    row_m = {0: (q >= w).astype(jnp.float32),
             2: (q < hw - w).astype(jnp.float32)}
    col_m = {0: (col > 0.5).astype(jnp.float32),
             2: (col < w - 1.5).astype(jnp.float32)}
    masks = {}
    for kh in range(3):
        for kw in range(3):
            m = None
            if kh != 1:
                m = row_m[kh]
            if kw != 1:
                m = col_m[kw] if m is None else m * col_m[kw]
            masks[(kh, kw)] = m

    bias = b_ref[...]                                                  # (Cout, 1)

    for p in range(db):
        acc = None
        for kh in range(3):
            for kw in range(3):
                y = None
                for kd in range(3):
                    part = jnp.dot(w_ref[(kd * 3 + kh) * 3 + kw], xs[p + kd],
                                   preferred_element_type=jnp.float32)
                    y = part if y is None else y + part
                s = (kh - 1) * w + (kw - 1)
                if s != 0:
                    # read position q+s  ==  roll by -s, then mask the invalid borders
                    y = pltpu.roll(y, (-s) % hw, 1)
                if masks[(kh, kw)] is not None:
                    y = y * masks[(kh, kw)]
                acc = y if acc is None else acc + y
        r = jnp.maximum(acc + bias, 0.0)
        if apply_post:
            r = jnp.dot(pw_ref[...], r, preferred_element_type=jnp.float32) + pb_ref[...]
        o_ref[0, p] = r.astype(o_ref.dtype)


def refine_conv3x3(x, w27, b, h, w, post_w=None, post_b=None, dblk=2):
    """3x3x3 Conv3d(pad=1) + folded BN + ReLU on x: (B, D, Cin, h*w).
    If post_w/post_b are given, a trailing 1x1 conv is fused into the epilogue.
    Returns (B, D, Cpost, h*w)."""
    bsz, d, cin, hw = x.shape
    assert hw == h * w and d % dblk == 0
    cout = w27.shape[1]
    apply_post = post_w is not None
    if post_w is None:
        post_w = jnp.eye(cout, dtype=jnp.float32)
        post_b = jnp.zeros((cout,), jnp.float32)
    cp = post_w.shape[0]
    col = (jnp.arange(hw, dtype=jnp.int32) % w).astype(jnp.float32).reshape(1, hw)

    def slab_spec(k):
        return pl.BlockSpec(
            (1, 1, cin, hw),
            lambda bb, t, k=k: (bb, jnp.clip(t * dblk + (k - 1), 0, d - 1), 0, 0))

    kern = functools.partial(_refine_kernel, h=h, w=w, d_total=d, db=dblk,
                             apply_post=apply_post)
    return pl.pallas_call(
        kern,
        out_shape=jax.ShapeDtypeStruct((bsz, d, cp, hw), jnp.float32),
        grid=(bsz, d // dblk),
        in_specs=[slab_spec(k) for k in range(dblk + 2)] + [
            pl.BlockSpec((27, cout, cin), lambda bb, t: (0, 0, 0)),
            pl.BlockSpec((cout, 1), lambda bb, t: (0, 0)),
            pl.BlockSpec((cp, cout), lambda bb, t: (0, 0)),
            pl.BlockSpec((cp, 1), lambda bb, t: (0, 0)),
            pl.BlockSpec((1, hw), lambda bb, t: (0, 0)),
        ],
        out_specs=pl.BlockSpec((1, dblk, cp, hw), lambda bb, t: (bb, t, 0, 0)),
        compiler_params=pltpu.CompilerParams(
            dimension_semantics=("parallel", "parallel")),
    )(*([x.astype(jnp.float32)] * (dblk + 2)), w27, b.reshape(cout, 1),
      post_w, post_b.reshape(cp, 1), col)


# ----------------------------------------------------------------------------
# pixel-shuffle layout transforms (one XLA transpose each)
# ----------------------------------------------------------------------------
def _shuffle_flat_to_fine(y, dc, hc, wc, cout):
    """(B, 8*Cout(kd,kh,kw,co), Dc*Hc*Wc) -> (B, 2Dc, Cout, (2Hc)*(2Wc))."""
    bsz = y.shape[0]
    y = y.reshape(bsz, 2, 2, 2, cout, dc, hc, wc)
    y = jnp.transpose(y, (0, 5, 1, 4, 6, 2, 7, 3))
    return y.reshape(bsz, 2 * dc, cout, (2 * hc) * (2 * wc))


def _shuffle_to_fine(y, dc, hc, wc, cout):
    """(B, Dc, 8*Cout(kd,kh,kw,co), Hc*Wc) -> (B, 2Dc, Cout, (2Hc)*(2Wc))."""
    bsz = y.shape[0]
    y = y.reshape(bsz, dc, 2, 2, 2, cout, hc, wc)
    y = jnp.transpose(y, (0, 1, 2, 5, 6, 3, 7, 4))
    return y.reshape(bsz, 2 * dc, cout, (2 * hc) * (2 * wc))


# ----------------------------------------------------------------------------
# SegHead4 forward (eval mode)
# ----------------------------------------------------------------------------
def segmentation_head_forward(x_tokens, params, grid_size=24):
    """x_tokens: (B, grid_size**3, C) -> (B, num_classes, 4*grid, 4*grid, 4*grid)."""
    bsz, n, c = x_tokens.shape
    d0 = grid_size

    # K1: proj + up1 gate + up1 transposed conv
    x0 = jnp.transpose(x_tokens, (0, 2, 1))                            # (B, C, D*H*W)
    pw, pb = fold_bn(params["proj"]["w"].reshape(c, c), params["proj"]["b"],
                     params["proj"]["bn"], out_axis=0)
    p1 = params["up1"]
    aw1, ab1 = fold_bn(p1["att_w"].reshape(c, c), p1["att_b"], p1["att_bn"], out_axis=0)
    sp1 = jax.nn.softplus(p1["att_bias"]).astype(jnp.float32)
    w8_1, b8_1 = convT2_to_rows(p1["up_w"], p1["up_b"])
    c2 = p1["up_w"].shape[1]
    y1 = fused_proj_gate_up(x0, pw, pb, aw1, ab1, sp1, w8_1, b8_1)     # (B, 8*c2, d0^3)
    xf1 = _shuffle_flat_to_fine(y1, d0, d0, d0, c2)                    # (B, 2d0, c2, (2d0)^2)

    # K2: up1 refinement conv
    rw1, rb1 = fold_bn(conv3x3_to_27(p1["ref_w"]), p1["ref_b"], p1["ref_bn"], out_axis=1)
    d1 = 2 * d0
    up1 = refine_conv3x3(xf1, rw1, rb1, d1, d1)                        # (B, d1, c2, d1*d1)
    # TODO(synk): deep_sup1/2 heads belong to the training branch only; skipped in eval.

    # K3: up2 gate + up2 transposed conv
    p2 = params["up2"]
    aw2, ab2 = fold_bn(p2["att_w"].reshape(c2, c2), p2["att_b"], p2["att_bn"], out_axis=0)
    sp2 = jax.nn.softplus(p2["att_bias"]).astype(jnp.float32)
    w8_2, b8_2 = convT2_to_rows(p2["up_w"], p2["up_b"])
    c3 = p2["up_w"].shape[1]
    y2 = fused_gate_up(up1, aw2, ab2, sp2, w8_2, b8_2)                 # (B, d1, 8*c3, d1^2)
    xf2 = _shuffle_to_fine(y2, d1, d1, d1, c3)                         # (B, 2d1, c3, (2d1)^2)

    # K4: up2 refinement conv with the final 1x1 conv fused into the epilogue
    rw2, rb2 = fold_bn(conv3x3_to_27(p2["ref_w"]), p2["ref_b"], p2["ref_bn"], out_axis=1)
    nc = params["final"]["w"].shape[0]
    fw = params["final"]["w"].reshape(nc, c3)
    d2 = 2 * d1
    out = refine_conv3x3(xf2, rw2, rb2, d2, d2, post_w=fw, post_b=params["final"]["b"])
    return jnp.transpose(out.reshape(bsz, d2, nc, d2, d2), (0, 2, 1, 3, 4))  # NCDHW


# ----------------------------------------------------------------------------
# pure-JAX reference (independent code path, for validation only)
# ----------------------------------------------------------------------------
def _reference_forward(x_tokens, params, grid_size=24, eps=1e-5):
    hi = lax.Precision.HIGHEST
    b, n, c = x_tokens.shape
    d = grid_size
    x = jnp.transpose(x_tokens, (0, 2, 1)).reshape(b, c, d, d, d)

    def bcast(v):
        return v[None, :, None, None, None]

    def bn(t, p):
        s = p["gamma"] / jnp.sqrt(p["var"] + eps)
        return (t - bcast(p["mean"])) * bcast(s) + bcast(p["beta"])

    def conv1(t, w, bias):
        return jnp.einsum("oc,bcdhw->bodhw", w, t, precision=hi) + bcast(bias)

    x = jnp.maximum(bn(conv1(x, params["proj"]["w"].reshape(c, c), params["proj"]["b"]),
                       params["proj"]["bn"]), 0.0)

    def upsample(t, p):
        cin = t.shape[1]
        a = jax.nn.sigmoid(bn(conv1(t, p["att_w"].reshape(cin, cin), p["att_b"]),
                              p["att_bn"]))
        g = t * (jax.nn.softplus(p["att_bias"]) + a)
        y = jnp.einsum("bixyz,ioklm->boxkylzm", g, p["up_w"], precision=hi)
        bb, oo = y.shape[0], y.shape[1]
        y = y.reshape(bb, oo, 2 * t.shape[2], 2 * t.shape[3], 2 * t.shape[4]) + bcast(p["up_b"])
        r = lax.conv_general_dilated(y, p["ref_w"], (1, 1, 1), ((1, 1), (1, 1), (1, 1)),
                                     dimension_numbers=("NCDHW", "OIDHW", "NCDHW"),
                                     precision=hi)
        return jnp.maximum(bn(r + bcast(p["ref_b"]), p["ref_bn"]), 0.0)

    up1 = upsample(x, params["up1"])
    up2 = upsample(up1, params["up2"])
    nc = params["final"]["w"].shape[0]
    return conv1(up2, params["final"]["w"].reshape(nc, up2.shape[1]), params["final"]["b"])


# ----------------------------------------------------------------------------
# deterministic synthetic parameters (PyTorch layouts / shapes)
# ----------------------------------------------------------------------------
def init_params(key, emb=32, num_classes=3):
    c1, c2, c3 = emb, emb // 4, emb // 8
    ki = iter(jax.random.split(key, 64))
    nrm = lambda shape, s=0.1: s * jax.random.normal(next(ki), shape, jnp.float32)

    def bn(c):
        return {"gamma": 1.0 + nrm((c,)), "beta": nrm((c,), 0.05),
                "mean": nrm((c,), 0.05),
                "var": 0.9 + 0.2 * jax.random.uniform(next(ki), (c,), jnp.float32)}

    def up_block(cin, cout):
        return {"att_w": nrm((cin, cin, 1, 1, 1)), "att_b": nrm((cin,), 0.05),
                "att_bn": bn(cin), "att_bias": jnp.array(0.3, jnp.float32),
                "up_w": nrm((cin, cout, 2, 2, 2)), "up_b": nrm((cout,), 0.05),
                "ref_w": nrm((cout, cout, 3, 3, 3)), "ref_b": nrm((cout,), 0.05),
                "ref_bn": bn(cout)}

    return {"proj": {"w": nrm((c1, emb, 1, 1, 1)), "b": nrm((c1,), 0.05), "bn": bn(c1)},
            "up1": up_block(c1, c2),
            "up2": up_block(c2, c3),
            "final": {"w": nrm((num_classes, c3, 1, 1, 1)), "b": nrm((num_classes,), 0.05)}}


# ----------------------------------------------------------------------------
# main
# ----------------------------------------------------------------------------
if __name__ == "__main__":
    key = jax.random.PRNGKey(0)
    k_param, k_x, k_t1, k_t2, k_t3, k_t4 = jax.random.split(key, 6)

    # --- micro-check 1: fused proj + gate + transposed-conv pointwise kernel vs jnp ---
    xt = jax.random.normal(k_t1, (1, 16, 1024), jnp.float32)
    wpt = 0.1 * jax.random.normal(k_t2, (16, 16), jnp.float32)
    bpt = 0.05 * jax.random.normal(k_t3, (16,), jnp.float32)
    wat = 0.1 * jax.random.normal(k_t4, (16, 16), jnp.float32)
    bat = 0.05 * jax.random.normal(k_t1, (16,), jnp.float32)
    w8t = 0.1 * jax.random.normal(k_t2, (40, 16), jnp.float32)
    b8t = 0.05 * jax.random.normal(k_t3, (40,), jnp.float32)
    spt = jnp.array(0.7, jnp.float32)
    got = fused_proj_gate_up(xt, wpt, bpt, wat, bat, spt, w8t, b8t)
    hh = jnp.maximum(jnp.einsum("oc,bcn->bon", wpt, xt) + bpt[None, :, None], 0.0)
    aa = jax.nn.sigmoid(jnp.einsum("oc,bcn->bon", wat, hh) + bat[None, :, None])
    ref = jnp.einsum("oc,bcn->bon", w8t, hh * (spt + aa)) + b8t[None, :, None]
    assert jnp.allclose(got, ref, atol=5e-2, rtol=5e-2)

    # --- micro-check 2: 3x3x3 conv kernel (roll + mask halo handling) vs lax.conv ---
    xc = jax.random.normal(k_t4, (1, 4, 8, 8, 8), jnp.float32)          # NCDHW
    w27 = 0.1 * jax.random.normal(k_t1, (27, 5, 4), jnp.float32)
    bc = 0.05 * jax.random.normal(k_t2, (5,), jnp.float32)
    xin = jnp.transpose(xc, (0, 2, 1, 3, 4)).reshape(1, 8, 4, 64)       # (B, D, C, H*W)
    got_c = refine_conv3x3(xin, w27, bc, 8, 8)
    got_c = jnp.transpose(got_c.reshape(1, 8, 5, 8, 8), (0, 2, 1, 3, 4))
    w_oi = jnp.transpose(w27.reshape(3, 3, 3, 5, 4), (3, 4, 0, 1, 2))
    ref_c = lax.conv_general_dilated(xc, w_oi, (1, 1, 1), ((1, 1), (1, 1), (1, 1)),
                                     dimension_numbers=("NCDHW", "OIDHW", "NCDHW"),
                                     precision=lax.Precision.HIGHEST)
    ref_c = jnp.maximum(ref_c + bc[None, :, None, None, None], 0.0)
    assert jnp.allclose(got_c, ref_c, atol=5e-2, rtol=5e-2)

    # --- full SegmentationHead(patch_size=4) forward: batch=2, emb=32, 24^3 tokens ---
    B, EMB, NC, GRID = 2, 32, 3, 24
    params = init_params(k_param, emb=EMB, num_classes=NC)
    x_tokens = jax.random.normal(k_x, (B, GRID ** 3, EMB), jnp.float32)

    fwd = jax.jit(lambda t, p: segmentation_head_forward(t, p, grid_size=GRID))
    out = jax.block_until_ready(fwd(x_tokens, params))
    assert out.shape == (B, NC, 96, 96, 96), out.shape
    assert bool(jnp.isfinite(out).all())

    ref_out = jax.jit(lambda t, p: _reference_forward(t, p, grid_size=GRID))(x_tokens, params)
    assert jnp.allclose(out, ref_out, atol=5e-2, rtol=5e-2), \
        float(jnp.abs(out - ref_out).max())

    print("KERNEL_OK")
</pallas_src>

<mosaic_0001>
module attributes {stable_mosaic.version = 11 : i64} {
  func.func @_proj_gate_up_kernel(%arg0: i32, %arg1: i32, %arg2: memref<1x16x1024xf32, #tpu.memory_space<vmem>>, %arg3: memref<16x16xf32, #tpu.memory_space<vmem>>, %arg4: memref<16x1xf32, #tpu.memory_space<vmem>>, %arg5: memref<16x16xf32, #tpu.memory_space<vmem>>, %arg6: memref<16x1xf32, #tpu.memory_space<vmem>>, %arg7: memref<40x16xf32, #tpu.memory_space<vmem>>, %arg8: memref<40x1xf32, #tpu.memory_space<vmem>>, %arg9: memref<1x1xf32, #tpu.memory_space<vmem>>, %arg10: memref<1x40x1024xf32, #tpu.memory_space<vmem>>) attributes {dimension_semantics = [#tpu.dimension_semantics<parallel>, #tpu.dimension_semantics<parallel>], iteration_bounds = array<i64: 1, 1>, scalar_prefetch = 0 : i64, scratch_operands = 0 : i64, tpu.core_type = #tpu.core_type<tc>, window_params = [{transform_indices = @transform_0, window_bounds = array<i64: 1, 16, 1024>}, {pipeline_mode = #tpu.pipeline_mode<synchronous>, transform_indices = @transform_1, window_bounds = array<i64: 16, 16>}, {pipeline_mode = #tpu.pipeline_mode<synchronous>, transform_indices = @transform_2, window_bounds = array<i64: 16, 1>}, {pipeline_mode = #tpu.pipeline_mode<synchronous>, transform_indices = @transform_3, window_bounds = array<i64: 16, 16>}, {pipeline_mode = #tpu.pipeline_mode<synchronous>, transform_indices = @transform_4, window_bounds = array<i64: 16, 1>}, {pipeline_mode = #tpu.pipeline_mode<synchronous>, transform_indices = @transform_5, window_bounds = array<i64: 40, 16>}, {pipeline_mode = #tpu.pipeline_mode<synchronous>, transform_indices = @transform_6, window_bounds = array<i64: 40, 1>}, {pipeline_mode = #tpu.pipeline_mode<synchronous>, transform_indices = @transform_7, window_bounds = array<i64: 1, 1>}, {transform_indices = @transform_8, window_bounds = array<i64: 1, 40, 1024>}]} {
    %c0 = arith.constant 0 : index
    %c0_0 = arith.constant 0 : index
    %c0_1 = arith.constant 0 : index
    %0 = vector.load %arg2[%c0, %c0_0, %c0_1] : memref<1x16x1024xf32, #tpu.memory_space<vmem>>, vector<1x16x1024xf32>
    %1 = vector.shape_cast %0 : vector<1x16x1024xf32> to vector<16x1024xf32>
    %c0_2 = arith.constant 0 : index
    %c0_3 = arith.constant 0 : index
    %2 = vector.load %arg3[%c0_2, %c0_3] : memref<16x16xf32, #tpu.memory_space<vmem>>, vector<16x16xf32>
    %cst = arith.constant dense<0.000000e+00> : vector<16x1024xf32>
    %3 = tpu.matmul %2, %1, %cst {dimension_numbers = #tpu.dot_dimension_numbers<[1], [0], [0], [1], [0, 0, 1, 1], [], []>} : vector<16x16xf32>, vector<16x1024xf32>, vector<16x1024xf32> -> vector<16x1024xf32>
    %c0_4 = arith.constant 0 : index
    %c0_5 = arith.constant 0 : index
    %4 = vector.load %arg4[%c0_4, %c0_5] : memref<16x1xf32, #tpu.memory_space<vmem>>, vector<16x1xf32>
    %5 = vector.broadcast %4 : vector<16x1xf32> to vector<16x1024xf32>
    %6 = arith.addf %3, %5 : vector<16x1024xf32>
    %cst_6 = arith.constant 0.000000e+00 : f32
    %7 = vector.broadcast %cst_6 : f32 to vector<16x1024xf32>
    %8 = arith.maximumf %6, %7 : vector<16x1024xf32>
    %c0_7 = arith.constant 0 : index
    %c0_8 = arith.constant 0 : index
    %9 = vector.load %arg5[%c0_7, %c0_8] : memref<16x16xf32, #tpu.memory_space<vmem>>, vector<16x16xf32>
    %cst_9 = arith.constant dense<0.000000e+00> : vector<16x1024xf32>
    %10 = tpu.matmul %9, %8, %cst_9 {dimension_numbers = #tpu.dot_dimension_numbers<[1], [0], [0], [1], [0, 0, 1, 1], [], []>} : vector<16x16xf32>, vector<16x1024xf32>, vector<16x1024xf32> -> vector<16x1024xf32>
    %c0_10 = arith.constant 0 : index
    %c0_11 = arith.constant 0 : index
    %11 = vector.load %arg6[%c0_10, %c0_11] : memref<16x1xf32, #tpu.memory_space<vmem>>, vector<16x1xf32>
    %12 = vector.broadcast %11 : vector<16x1xf32> to vector<16x1024xf32>
    %13 = arith.addf %10, %12 : vector<16x1024xf32>
    %14 = arith.negf %13 : vector<16x1024xf32>
    %15 = math.exp %14 : vector<16x1024xf32>
    %cst_12 = arith.constant 1.000000e+00 : f32
    %16 = vector.broadcast %cst_12 : f32 to vector<16x1024xf32>
    %17 = arith.addf %16, %15 : vector<16x1024xf32>
    %18 = arith.divf %16, %17 : vector<16x1024xf32>
    %c0_13 = arith.constant 0 : index
    %c0_14 = arith.constant 0 : index
    %19 = vector.load %arg9[%c0_13, %c0_14] : memref<1x1xf32, #tpu.memory_space<vmem>>, vector<1x1xf32>
    %20 = vector.extract %19[0, 0] : f32 from vector<1x1xf32>
    %21 = vector.broadcast %20 : f32 to vector<16x1024xf32>
    %22 = arith.addf %21, %18 : vector<16x1024xf32>
    %23 = arith.mulf %8, %22 : vector<16x1024xf32>
    %c0_15 = arith.constant 0 : index
    %c0_16 = arith.constant 0 : index
    %24 = vector.load %arg7[%c0_15, %c0_16] : memref<40x16xf32, #tpu.memory_space<vmem>>, vector<40x16xf32>
    %cst_17 = arith.constant dense<0.000000e+00> : vector<40x1024xf32>
    %25 = tpu.matmul %24, %23, %cst_17 {dimension_numbers = #tpu.dot_dimension_numbers<[1], [0], [0], [1], [0, 0, 1, 1], [], []>} : vector<40x16xf32>, vector<16x1024xf32>, vector<40x1024xf32> -> vector<40x1024xf32>
    %c0_18 = arith.constant 0 : index
    %c0_19 = arith.constant 0 : index
    %26 = vector.load %arg8[%c0_18, %c0_19] : memref<40x1xf32, #tpu.memory_space<vmem>>, vector<40x1xf32>
    %27 = vector.broadcast %26 : vector<40x1xf32> to vector<40x1024xf32>
    %28 = arith.addf %25, %27 : vector<40x1024xf32>
    %c0_20 = arith.constant 0 : index
    %c0_21 = arith.constant 0 : index
    %c0_22 = arith.constant 0 : index
    %29 = vector.load %arg10[%c0_20, %c0_21, %c0_22] : memref<1x40x1024xf32, #tpu.memory_space<vmem>>, vector<1x40x1024xf32>
    %30 = vector.shape_cast %29 : vector<1x40x1024xf32> to vector<40x1024xf32>
    %31 = vector.shape_cast %28 : vector<40x1024xf32> to vector<1x40x1024xf32>
    tpu.vector_store %arg10[%c0_20, %c0_21, %c0_22], %31 {strides = array<i32>} : memref<1x40x1024xf32, #tpu.memory_space<vmem>>, vector<1x40x1024xf32>,
    return
  }
  func.func @transform_0(%arg0: i32, %arg1: i32) -> (i32, i32, i32) {
    %c0_i32 = arith.constant 0 : i32
    %c0_i32_0 = arith.constant 0 : i32
    return %arg0, %c0_i32, %arg1 : i32, i32, i32
  }
  func.func @transform_1(%arg0: i32, %arg1: i32) -> (i32, i32) {
    %c0_i32 = arith.constant 0 : i32
    %c0_i32_0 = arith.constant 0 : i32
    %c0_i32_1 = arith.constant 0 : i32
    return %c0_i32, %c0_i32_0 : i32, i32
  }
  func.func @transform_2(%arg0: i32, %arg1: i32) -> (i32, i32) {
    %c0_i32 = arith.constant 0 : i32
    %c0_i32_0 = arith.constant 0 : i32
    %c0_i32_1 = arith.constant 0 : i32
    return %c0_i32, %c0_i32_0 : i32, i32
  }
  func.func @transform_3(%arg0: i32, %arg1: i32) -> (i32, i32) {
    %c0_i32 = arith.constant 0 : i32
    %c0_i32_0 = arith.constant 0 : i32
    %c0_i32_1 = arith.constant 0 : i32
    return %c0_i32, %c0_i32_0 : i32, i32
  }
  func.func @transform_4(%arg0: i32, %arg1: i32) -> (i32, i32) {
    %c0_i32 = arith.constant 0 : i32
    %c0_i32_0 = arith.constant 0 : i32
    %c0_i32_1 = arith.constant 0 : i32
    return %c0_i32, %c0_i32_0 : i32, i32
  }
  func.func @transform_5(%arg0: i32, %arg1: i32) -> (i32, i32) {
    %c0_i32 = arith.constant 0 : i32
    %c0_i32_0 = arith.constant 0 : i32
    %c0_i32_1 = arith.constant 0 : i32
    return %c0_i32, %c0_i32_0 : i32, i32
  }
  func.func @transform_6(%arg0: i32, %arg1: i32) -> (i32, i32) {
    %c0_i32 = arith.constant 0 : i32
    %c0_i32_0 = arith.constant 0 : i32
    %c0_i32_1 = arith.constant 0 : i32
    return %c0_i32, %c0_i32_0 : i32, i32
  }
  func.func @transform_7(%arg0: i32, %arg1: i32) -> (i32, i32) {
    %c0_i32 = arith.constant 0 : i32
    %c0_i32_0 = arith.constant 0 : i32
    %c0_i32_1 = arith.constant 0 : i32
    return %c0_i32, %c0_i32_0 : i32, i32
  }
  func.func @transform_8(%arg0: i32, %arg1: i32) -> (i32, i32, i32) {
    %c0_i32 = arith.constant 0 : i32
    %c0_i32_0 = arith.constant 0 : i32
    return %arg0, %c0_i32, %arg1 : i32, i32, i32
  }
}

</mosaic_0001>

<bundles_post_ra>
// kernel: tpu_custom_call.1
= control target key start
LH: loop header
LB: loop body
LE: loop exit
PB: predicated region body
PF: predicated region fallthrough
CT: control target
= control target key end

     0   :  { %s2312_s0 = inlined_call_operand.hbm [shape: f32[1,16,1024], index: 0, kind: input, shape index: {}]   ;;  %s2313_s1 = inlined_call_operand.vmem [shape: f32[16,16], index: 1, kind: input, shape index: {}]   ;;  %s2314_s2 = inlined_call_operand.vmem [shape: f32[16,1], index: 2, kind: input, shape index: {}]   ;;  %s2315_s3 = inlined_call_operand.vmem [shape: f32[16,16], index: 3, kind: input, shape index: {}]   ;;  %s2316_s4 = inlined_call_operand.vmem [shape: f32[16,1], index: 4, kind: input, shape index: {}]   ;;  %s2317_s5 = inlined_call_operand.vmem [shape: f32[40,16], index: 5, kind: input, shape index: {}]   ;;  %s2318_s6 = inlined_call_operand.vmem [shape: f32[40,1], index: 6, kind: input, shape index: {}]   ;;  %s2319_s7 = inlined_call_operand.<no memory space> [shape: f32[1,1], index: 7, kind: input, shape index: {}]   ;;  %s2320_s8 = inlined_call_operand.hbm [shape: f32[1,40,1024], index: 8, kind: output, shape index: {}]  }
   0x1   :  { %v13_v0 = vstv %s2319_s7 }
   0x2   :  { %14 = vst [vmem:[#allocation2] sm:$0x1] %v13_v0 }
   0x3   :  { %15 = vsyncpa [#allocation4], 0 }
   0x4   :  { %16 = vsyncpa [#allocation5], 0  ;;  %s21_s9 = sshll.u32 %s2312_s0, 4  ;;  %s1407_s10 = smov [#allocation3]   ;;  %s22_s9 = int_to_ptr.hbm [resolvable:$true] %s21_s9 }
   0x5   :  { %s23_s11 = sshll.u32 %s1407_s10, 4  ;;  %s1408_s12 = smov 1024   ;;  %s24_s11 = int_to_ptr.vmem [resolvable:$true] %s23_s11 }
   0x6   :  { %s1409_s13 = smov 64  }
   0x7   :  { %29 = dma.hbm_to_vmem [thread:$0]  %s22_s9, 2048, %s24_s11, [#allocation4], %s1408_s12, %s1408_s12, %s1409_s13  }
   0x8   :  { %1403 = dma.done.wait [#allocation4], 2048  }
   0x9   :  { %1404 = vsyncadd [#allocation4], 4294965248  ;;  %v1410_v1 = vmov 0   ;;  %v56_v2 = vld [vmem:[#allocation3 + $0x40] sm:$0xff]  ;;  %v57_v3 = vld [vmem:[#allocation3 + $0x48] sm:$0xff]  ;;  %vm78_vm0 = vcmask 130048  }
   0xa   :  { %1288 = vset.pattern.permute.xlu0 %v1410_v1  ;;  %1289 = vset.pattern.permute.xlu1 %v1410_v1  ;;  %v58_v4 = vld [vmem:[#allocation3 + $0x50] sm:$0xff]  ;;  %v59_v5 = vld [vmem:[#allocation3 + $0x58] sm:$0xff]  ;;  %v48_v6 = vld [vmem:[#allocation3] sm:$0xff]  ;;  %s1180_s23 = sshll.u32 %s2320_s8, 4  ;;  %s1181_s23 = int_to_ptr.hbm [resolvable:$true] %s1180_s23 }
   0xb   :  { %1290 = vset.pattern.permute.xlu2 %v1410_v1  ;;  %99 = vmatpush.msra.mxu0 %v56_v2  ;;  %v49_v7 = vld [vmem:[#allocation3 + $0x8] sm:$0xff]  ;;  %v50_v8 = vld [vmem:[#allocation3 + $0x10] sm:$0xff]  ;;  %v51_v9 = vld [vmem:[#allocation3 + $0x18] sm:$0xff] }
   0xc   :  { %122 = vmatpush.msra.mxu1 %v57_v3  ;;  %145 = vmatpush.msra.mxu2 %v58_v4  ;;  %v64_v10 = vld [vmem:[%s2313_s1] sm:$0xff]  ;;  %v67_v11 = vld [vmem:[%s2314_s2 + $0x8] sm:$0xff]  ;;  %v62_v14 = vld [vmem:[#allocation3 + $0x70] sm:$0xff] }
   0xd   :  { %168 = vmatpush.msra.mxu3 %v59_v5  ;;  %100 = vmatpush.msra.mxu0 %v48_v6  ;;  %v60_v12 = vld [vmem:[#allocation3 + $0x60] sm:$0xff]  ;;  %v61_v13 = vld [vmem:[#allocation3 + $0x68] sm:$0xff]  ;;  %v63_v15 = vld [vmem:[#allocation3 + $0x78] sm:$0xff] }
   0xe   :  { %123 = vmatpush.msra.mxu1 %v49_v7  ;;  %146 = vmatpush.msra.mxu2 %v50_v8  ;;  %v52_v16 = vld [vmem:[#allocation3 + $0x20] sm:$0xff]  ;;  %v53_v17 = vld [vmem:[#allocation3 + $0x28] sm:$0xff]  ;;  %v54_v18 = vld [vmem:[#allocation3 + $0x30] sm:$0xff] }
   0xf   :  { %169 = vmatpush.msra.mxu3 %v51_v9  ;;  %1193 = vmatmul.msk.f32.vlgmr.msra.gmra.mxu0 %vm78_vm0, %v64_v10  ;;  %v55_v19 = vld [vmem:[#allocation3 + $0x38] sm:$0xff]  ;;  %v65_v20 = vld [vmem:[%s2313_s1 + $0x8] sm:$0xff]  ;;  %v835_v22 = vld [vmem:[%s2318_s6 + $0x10] sm:$0xff] }
  0x10   :  { %1195 = vmatmul.msk.f32.vlgmr.msra.gmra.mxu1 %vm78_vm0, %v64_v10  ;;  %1197 = vmatmul.msk.f32.vlgmr.msra.gmra.mxu2 %vm78_vm0, %v64_v10  ;;  %v66_v21 = vld [vmem:[%s2314_s2] sm:$0xff]  ;;  %v288_v23 = vld [vmem:[%s2316_s4 + $0x8] sm:$0xff]  ;;  %v836_v35 = vld [vmem:[%s2318_s6 + $0x18] sm:$0xff] }
  0x11   :  { %1199 = vmatmul.msk.f32.vlgmr.msra.gmra.mxu3 %vm78_vm0, %v64_v10  ;;  %75 = vperm.xlu0 %1288, %v67_v11   ;;  %v287_v24 = vld [vmem:[%s2316_s4] sm:$0xff]  ;;  %v286_v56 = vld [vmem:[%s2315_s3 + $0x8] sm:$0xff] }
  0x12   :  { %191 = vmatpush.msrb.mxu0 %v60_v12  ;;  %214 = vmatpush.msrb.mxu1 %v61_v13  ;;  %v1526_v41 = vld [vmem:[%s2315_s3] sm:$0xff] }
  0x13   :  { %237 = vmatpush.msrb.mxu2 %v62_v14  ;;  %260 = vmatpush.msrb.mxu3 %v63_v15  ;;  %v793_v46 = vld [vmem:[#allocation2] sm:$0x1] }
  0x14   :  { %192 = vmatpush.msrb.mxu0 %v52_v16  ;;  %215 = vmatpush.msrb.mxu1 %v53_v17  ;;  %1281 = vpush %v793_v46 }
  0x15   :  { %238 = vmatpush.msrb.mxu2 %v54_v18  ;;  %261 = vmatpush.msrb.mxu3 %v55_v19 }
  0x16   :  { %296 = vperm.xlu1 %1289, %v288_v23  }
  0x17   :  { %1194 = vmatmul.msk.f32.gmra.mxu0 %vm78_vm0, %v65_v20 }
  0x18   :  { %1196 = vmatmul.msk.f32.gmra.mxu1 %vm78_vm0, %v65_v20  ;;  %1198 = vmatmul.msk.f32.gmra.mxu2 %vm78_vm0, %v65_v20 }
  0x19   :  { %1200 = vmatmul.msk.f32.gmra.mxu3 %vm78_vm0, %v65_v20  ;;  %70 = vperm.xlu0 %1288, %v66_v21  }
  0x1e   :  { %291 = vperm.xlu1 %1289, %v287_v24  }
  0x1f   :  { %1201 = vmatmul.msk.f32.vlgmr.msrb.gmra.mxu0 %vm78_vm0, %v64_v10 }
  0x20   :  { %1203 = vmatmul.msk.f32.vlgmr.msrb.gmra.mxu1 %vm78_vm0, %v64_v10  ;;  %1205 = vmatmul.msk.f32.vlgmr.msrb.gmra.mxu2 %vm78_vm0, %v64_v10 }
  0x21   :  { %1207 = vmatmul.msk.f32.vlgmr.msrb.gmra.mxu3 %vm78_vm0, %v64_v10  ;;  %850 = vperm.xlu0 %1288, %v835_v22  }
  0x26   :  { %855 = vperm.xlu1 %1289, %v836_v35  }
  0x27   :  { %1202 = vmatmul.msk.f32.gmra.mxu0 %vm78_vm0, %v65_v20 }
  0x28   :  { %1204 = vmatmul.msk.f32.gmra.mxu1 %vm78_vm0, %v65_v20  ;;  %1206 = vmatmul.msk.f32.gmra.mxu2 %vm78_vm0, %v65_v20 }
  0x29   :  { %1208 = vmatmul.msk.f32.gmra.mxu3 %vm78_vm0, %v65_v20 }
  0x45   :  { %s1282_s3 = spop %1281 }
  0x83   :  { %v1503_v25 = vpop.permute.xlu0 %75 }
  0x88   :  { %v1628_v15 = vpop.permute.xlu1 %296 }
  0x8b   :  { %v71_v30 = vpop.permute.xlu0 %70 }
  0x8c   :  { %v102_v26 = vpop.f32.mrf.mxu0 }
  0x8d   :  { %v125_v27 = vpop.f32.mrf.mxu1  ;;  %v1505_v32 = vadd.f32 %v102_v26, %v71_v30 }
  0x8e   :  { %v1513_v36 = vadd.f32 %v125_v27, %v71_v30 }
  0x8f   :  { %v2334_v40 = vmax.f32 %v1505_v32, 0.0 }
  0x90   :  { %v2333_v42 = vmax.f32 %v1513_v36, 0.0  ;;  %v1630_v16 = vpop.permute.xlu1 %291 }
  0x93   :  { %v148_v28 = vpop.f32.mrf.mxu2 }
  0x94   :  { %v171_v29 = vpop.f32.mrf.mxu3  ;;  %v105_v31 = vpop.f32.mrf.mxu0  ;;  %v1531_v43 = vadd.f32 %v148_v28, %v71_v30 }
  0x95   :  { %v1508_v33 = vadd.f32 %v105_v31, %v1503_v25  ;;  %v128_v34 = vpop.f32.mrf.mxu1  ;;  %v1535_v47 = vadd.f32 %v171_v29, %v71_v30 }
  0x96   :  { %v1516_v37 = vadd.f32 %v128_v34, %v1503_v25  ;;  %v2330_v54 = vmax.f32 %v1531_v43, 0.0 }
  0x97   :  { %v277_v38 = vmax.f32 %v1508_v33, 0.0  ;;  %v2329_v55 = vmax.f32 %v1535_v47, 0.0 }
  0x98   :  { %v2335_v39 = vmax.f32 %v1516_v37, 0.0 }
  0x99   :  { %319 = vmatpush.msra.mxu0 %v277_v38 }
  0x9a   :  { %342 = vmatpush.msra.mxu1 %v2335_v39 }
  0x9b   :  { %v151_v44 = vpop.f32.mrf.mxu2  ;;  %320 = vmatpush.msra.mxu0 %v2334_v40 }
  0x9c   :  { %v174_v45 = vpop.f32.mrf.mxu3  ;;  %v1538_v48 = vadd.f32 %v151_v44, %v1503_v25  ;;  %343 = vmatpush.msra.mxu1 %v2333_v42  ;;  %v194_v50 = vpop.f32.mrf.mxu0  ;;  %1209 = vmatmul.msk.f32.vlgmr.msra.gmra.mxu0 %vm78_vm0, %v1526_v41 }
  0x9d   :  { %v1541_v49 = vadd.f32 %v174_v45, %v1503_v25  ;;  %v217_v51 = vpop.f32.mrf.mxu1  ;;  %1211 = vmatmul.msk.f32.vlgmr.msra.gmra.mxu1 %vm78_vm0, %v1526_v41  ;;  %v1573_v62 = vadd.f32 %v194_v50, %v71_v30 }
  0x9e   :  { %v2332_v52 = vmax.f32 %v1538_v48, 0.0  ;;  %v1575_v63 = vadd.f32 %v217_v51, %v71_v30 }
  0x9f   :  { %v2331_v53 = vmax.f32 %v1541_v49, 0.0  ;;  %v2326_v3 = vmax.f32 %v1573_v62, 0.0 }
  0xa0   :  { %365 = vmatpush.msra.mxu2 %v2332_v52  ;;  %v2325_v4 = vmax.f32 %v1575_v63, 0.0 }
  0xa1   :  { %388 = vmatpush.msra.mxu3 %v2331_v53 }
  0xa2   :  { %366 = vmatpush.msra.mxu2 %v2330_v54 }
  0xa3   :  { %389 = vmatpush.msra.mxu3 %v2329_v55  ;;  %v240_v57 = vpop.f32.mrf.mxu2  ;;  %1213 = vmatmul.msk.f32.vlgmr.msra.gmra.mxu2 %vm78_vm0, %v1526_v41 }
  0xa4   :  { %v263_v58 = vpop.f32.mrf.mxu3  ;;  %1215 = vmatmul.msk.f32.vlgmr.msra.gmra.mxu3 %vm78_vm0, %v1526_v41  ;;  %v197_v59 = vpop.f32.mrf.mxu0  ;;  %1210 = vmatmul.msk.f32.gmra.mxu0 %vm78_vm0, %v286_v56  ;;  %v1588_v5 = vadd.f32 %v240_v57, %v71_v30 }
  0xa5   :  { %v1570_v60 = vadd.f32 %v197_v59, %v1503_v25  ;;  %v220_v61 = vpop.f32.mrf.mxu1  ;;  %1212 = vmatmul.msk.f32.gmra.mxu1 %vm78_vm0, %v286_v56  ;;  %v1592_v8 = vadd.f32 %v263_v58, %v71_v30 }
  0xa6   :  { %v1578_v0 = vadd.f32 %v220_v61, %v1503_v25  ;;  %v2322_v13 = vmax.f32 %v1588_v5, 0.0 }
  0xa7   :  { %v2328_v1 = vmax.f32 %v1570_v60, 0.0  ;;  %v2321_v14 = vmax.f32 %v1592_v8, 0.0 }
  0xa8   :  { %v2327_v2 = vmax.f32 %v1578_v0, 0.0 }
  0xa9   :  { %411 = vmatpush.msrb.mxu0 %v2328_v1 }
  0xaa   :  { %434 = vmatpush.msrb.mxu1 %v2327_v2 }
  0xab   :  { %v243_v6 = vpop.f32.mrf.mxu2  ;;  %1214 = vmatmul.msk.f32.gmra.mxu2 %vm78_vm0, %v286_v56  ;;  %412 = vmatpush.msrb.mxu0 %v2326_v3 }
  0xac   :  { %v266_v7 = vpop.f32.mrf.mxu3  ;;  %1216 = vmatmul.msk.f32.gmra.mxu3 %vm78_vm0, %v286_v56  ;;  %v1595_v9 = vadd.f32 %v243_v6, %v1503_v25  ;;  %435 = vmatpush.msrb.mxu1 %v2325_v4 }
  0xad   :  { %v1598_v10 = vadd.f32 %v266_v7, %v1503_v25  ;;  %1217 = vmatmul.msk.f32.vlgmr.msrb.gmra.mxu0 %vm78_vm0, %v1526_v41  ;;  %1219 = vmatmul.msk.f32.vlgmr.msrb.gmra.mxu1 %vm78_vm0, %v1526_v41 }
  0xae   :  { %v2324_v11 = vmax.f32 %v1595_v9, 0.0 }
  0xaf   :  { %v2323_v12 = vmax.f32 %v1598_v10, 0.0 }
  0xb0   :  { %457 = vmatpush.msrb.mxu2 %v2324_v11 }
  0xb1   :  { %480 = vmatpush.msrb.mxu3 %v2323_v12 }
  0xb2   :  { %458 = vmatpush.msrb.mxu2 %v2322_v13 }
  0xb3   :  { %481 = vmatpush.msrb.mxu3 %v2321_v14  ;;  %1221 = vmatmul.msk.f32.vlgmr.msrb.gmra.mxu2 %vm78_vm0, %v1526_v41 }
  0xb4   :  { %1223 = vmatmul.msk.f32.vlgmr.msrb.gmra.mxu3 %vm78_vm0, %v1526_v41 }
  0xb5   :  { %1218 = vmatmul.msk.f32.gmra.mxu0 %vm78_vm0, %v286_v56  ;;  %1220 = vmatmul.msk.f32.gmra.mxu1 %vm78_vm0, %v286_v56 }
  0xbb   :  { %1222 = vmatmul.msk.f32.gmra.mxu2 %vm78_vm0, %v286_v56 }
  0xbc   :  { %1224 = vmatmul.msk.f32.gmra.mxu3 %vm78_vm0, %v286_v56 }
 0x119   :  { %v322_v17 = vpop.f32.mrf.mxu0 }
 0x11a   :  { %v323_v18 = vadd.f32 %v322_v17, %v1630_v16  ;;  %v345_v19 = vpop.f32.mrf.mxu1 }
 0x11b   :  { %v346_v20 = vadd.f32 %v345_v19, %v1630_v16 }
 0x11c   :  { %v1225_v21 = vmul.f32 -1.442695, %v323_v18 }
 0x11d   :  { %v1226_v22 = vmul.f32 -1.442695, %v346_v20 }
 0x11e   :  { %1291 = vpow2.f32 %v1225_v21 }
 0x11f   :  { %1293 = vpow2.f32 %v1226_v22  ;;  %v1653_v22 = vstv %s1282_s3 }
 0x121   :  { %v325_v23 = vpop.f32.mrf.mxu0 }
 0x122   :  { %v326_v24 = vadd.f32 %v325_v23, %v1628_v15  ;;  %v348_v25 = vpop.f32.mrf.mxu1 }
 0x123   :  { %v349_v26 = vadd.f32 %v348_v25, %v1628_v15 }
 0x124   :  { %v1292_v27 = vpop.eup %1291  ;;  %v1233_v28 = vmul.f32 -1.442695, %v326_v24 }
 0x125   :  { %v1294_v29 = vpop.eup %1293  ;;  %v1636_v30 = vadd.f32 1.0, %v1292_v27  ;;  %v1234_v31 = vmul.f32 -1.442695, %v349_v26 }
 0x126   :  { %v1638_v34 = vadd.f32 1.0, %v1294_v29  ;;  %1295 = vpow2.f32 %v1233_v28  ;;  %v368_v35 = vpop.f32.mrf.mxu2 }
 0x127   :  { %v391_v41 = vpop.f32.mrf.mxu3  ;;  %1297 = vrcp.f32 %v1636_v30  ;;  %v369_v44 = vadd.f32 %v368_v35, %v1630_v16  ;;  %v564_v18 = vand.u32 2147483648, %v1636_v30  ;;  %v562_v25 = vand.u32 2147483647, %v1636_v30 }
 0x128   :  { %v392_v45 = vadd.f32 %v391_v41, %v1630_v16  ;;  %1299 = vrcp.f32 %v1638_v34  ;;  %v579_v26 = vand.u32 2147483648, %v1638_v34  ;;  %vm558_vm2 = vweird.f32 %v1636_v30 }
 0x129   :  { %1301 = vpow2.f32 %v1234_v31  ;;  %v1227_v46 = vmul.f32 -1.442695, %v369_v44  ;;  %v1670_v44 = vor.u32 1.1754944e-38, %v564_v18  ;;  %vm1726_vm7 = vcmp.eq.f32.partialorder %v562_v25, 8.507059e+37 }
 0x12a   :  { %v1228_v50 = vmul.f32 -1.442695, %v392_v45  ;;  %v414_v51 = vpop.f32.mrf.mxu0  ;;  %v437_v56 = vpop.f32.mrf.mxu1  ;;  %v1683_v18 = vor.u32 1.1754944e-38, %v579_v26  ;;  %vm573_vm11 = vweird.f32 %v1638_v34 }
 0x12b   :  { %1303 = vpow2.f32 %v1227_v46  ;;  %v415_v57 = vadd.f32 %v414_v51, %v1630_v16  ;;  %v438_v58 = vadd.f32 %v437_v56, %v1630_v16 }
 0x12c   :  { %v1296_v59 = vpop.eup %1295  ;;  %1305 = vpow2.f32 %v1228_v50 }
 0x12d   :  { %v1646_v61 = vpop.eup %1297  ;;  %v1648_v6 = vadd.f32 1.0, %v1296_v59  ;;  %v1229_v7 = vmul.f32 -1.442695, %v415_v57  ;;  %v1230_v17 = vmul.f32 -1.442695, %v438_v58 }
 0x12e   :  { %v1651_v19 = vpop.eup %1299  ;;  %v371_v20 = vpop.f32.mrf.mxu2  ;;  %v1661_v27 = vmul.f32 %v1646_v61, %v1636_v30  ;;  %v577_v57 = vand.u32 2147483647, %v1638_v34  ;;  %vm559_vm3 = vweird.f32 %v1646_v61 }
 0x12f   :  { %v394_v21 = vpop.f32.mrf.mxu3  ;;  %v1302_v23 = vpop.eup %1301  ;;  %1307 = vrcp.f32 %v1648_v6  ;;  %v372_v24 = vadd.f32 %v371_v20, %v1628_v15  ;;  %v1668_v35 = vmul.f32 %v1651_v19, %v1638_v34  ;;  %vm678_vm1 = vweird.f32 %v1648_v6  ;;  %vm1803_vm13 = vmor %vm558_vm2, %vm559_vm3  ;;  %v1877_v34 = vld [vmem:[%s2317_s5] sm:$0xff] }
 0x130   :  { %v1663_v28 = vadd.f32 1.0, %v1302_v23  ;;  %1309 = vpow2.f32 %v1229_v7  ;;  %v395_v29 = vadd.f32 %v394_v21, %v1628_v15  ;;  %v684_v26 = vand.u32 2147483648, %v1648_v6 }
 0x131   :  { %v1304_v31 = vpop.eup %1303  ;;  %1311 = vpow2.f32 %v1230_v17  ;;  %v1235_v41 = vmul.f32 -1.442695, %v372_v24  ;;  %v555_v17 = vsub.f32 1.0, %v1661_v27  ;;  %v570_v21 = vsub.f32 1.0, %v1668_v35 }
 0x132   :  { %v1306_v45 = vpop.eup %1305  ;;  %1313 = vrcp.f32 %v1663_v28  ;;  %v1673_v46 = vadd.f32 1.0, %v1304_v31  ;;  %v1236_v50 = vmul.f32 -1.442695, %v395_v29  ;;  %v417_v51 = vpop.f32.mrf.mxu0  ;;  %vm693_vm4 = vweird.f32 %v1663_v28 }
 0x133   :  { %v440_v56 = vpop.f32.mrf.mxu1  ;;  %v1676_v58 = vadd.f32 1.0, %v1306_v45  ;;  %1315 = vpow2.f32 %v1235_v41  ;;  %v418_v59 = vadd.f32 %v417_v51, %v1628_v15  ;;  %v682_v51 = vand.u32 2147483647, %v1648_v6 }
 0x134   :  { %v441_v7 = vadd.f32 %v440_v56, %v1628_v15  ;;  %1317 = vrcp.f32 %v1673_v46  ;;  %vm1788_vm12 = vcmp.eq.f32.partialorder %v577_v57, 8.507059e+37  ;;  %vm574_vm2 = vweird.f32 %v1651_v19 }
 0x135   :  { %v1685_v20 = vpop.eup %1307  ;;  %1319 = vrcp.f32 %v1676_v58  ;;  %v1237_v23 = vmul.f32 -1.442695, %v418_v59  ;;  %vm1718_vm6 = vcmp.eq.f32.partialorder %v682_v51, 8.507059e+37  ;;  %vm1859_vm3 = vmor %vm573_vm11, %vm574_vm2 }
 0x136   :  { %v1238_v24 = vmul.f32 -1.442695, %v441_v7  ;;  %v1310_v29 = vpop.eup %1309  ;;  %v674_v31 = vmul.f32 %v1685_v20, %v1648_v6  ;;  %1321 = vpow2.f32 %v1236_v50  ;;  %v460_v41 = vpop.f32.mrf.mxu2  ;;  %v697_v50 = vand.u32 2147483647, %v1663_v28 }
 0x137   :  { %v483_v45 = vpop.f32.mrf.mxu3  ;;  %v1312_v56 = vpop.eup %1311  ;;  %v1693_v14 = vadd.f32 1.0, %v1310_v29  ;;  %1323 = vpow2.f32 %v1237_v23  ;;  %v461_v13 = vadd.f32 %v460_v41, %v1630_v16  ;;  %vm679_vm5 = vweird.f32 %v1685_v20 }
 0x138   :  { %v484_v59 = vadd.f32 %v483_v45, %v1630_v16  ;;  %v1697_v7 = vpop.eup %1313  ;;  %v675_v12 = vsub.f32 1.0, %v674_v31  ;;  %v1699_v11 = vadd.f32 1.0, %v1312_v56  ;;  %1325 = vpow2.f32 %v1238_v24  ;;  %vm1746_vm8 = vmor %vm678_vm1, %vm679_vm5 }
 0x139   :  { %v1316_v4 = vpop.eup %1315  ;;  %v689_v23 = vmul.f32 %v1697_v7, %v1663_v28  ;;  %1327 = vrcp.f32 %v1693_v14  ;;  %v1231_v29 = vmul.f32 -1.442695, %v461_v13  ;;  %v699_v45 = vand.u32 2147483648, %v1663_v28 }
 0x13a   :  { %v1232_v16 = vmul.f32 -1.442695, %v484_v59  ;;  %v1707_v41 = vpop.eup %1317  ;;  %v676_v31 = vmul.f32 %v1685_v20, %v675_v12  ;;  %1329 = vrcp.f32 %v1699_v11  ;;  %v1711_v24 = vadd.f32 1.0, %v1316_v4 }
 0x13b   :  { %v1714_v56 = vpop.eup %1319  ;;  %1331 = vpow2.f32 %v1231_v29  ;;  %v690_v3 = vsub.f32 1.0, %v689_v23  ;;  %v685_v12 = vor.u32 1.1754944e-38, %v684_v26  ;;  %v1732_v51 = vmul.f32 %v1707_v41, %v1673_v46 }
 0x13c   :  { %v1322_v59 = vpop.eup %1321  ;;  %1333 = vrcp.f32 %v1711_v24  ;;  %v677_v4 = vadd.f32 %v1685_v20, %v676_v31  ;;  %v1736_v1 = vmul.f32 %v1714_v56, %v1676_v58  ;;  %vm694_vm9 = vweird.f32 %v1697_v7 }
 0x13d   :  { %v1324_v29 = vpop.eup %1323  ;;  %v1738_v23 = vadd.f32 1.0, %v1322_v59  ;;  %1335 = vpow2.f32 %v1232_v16  ;;  %vm1751_vm10 = vcmp.eq.f32.partialorder %v697_v50, 8.507059e+37  ;;  %v700_v16 = vor.u32 1.1754944e-38, %v699_v45  ;;  %vm695_vm15 = vmor %vm693_vm4, %vm694_vm9 }
 0x13e   :  { %v1326_v31 = vpop.eup %1325  ;;  %v1740_v26 = vadd.f32 1.0, %v1324_v29  ;;  %v463_v55 = vpop.f32.mrf.mxu2  ;;  %v681_v6 = vsel %vm1746_vm8, %v1685_v20, %v677_v4  ;;  %v691_v50 = vmul.f32 %v1697_v7, %v690_v3  ;;  %vm708_vm14 = vweird.f32 %v1711_v24 }
 0x13f   :  { %v486_v25 = vpop.f32.mrf.mxu3  ;;  %v1755_v59 = vpop.eup %1327  ;;  %1337 = vrcp.f32 %v1738_v23  ;;  %v1758_v29 = vadd.f32 1.0, %v1326_v31  ;;  %v464_v52 = vadd.f32 %v463_v55, %v1628_v15  ;;  %v556_v31 = vmul.f32 %v1646_v61, %v555_v17 }
 0x140   :  { %v1765_v42 = vpop.eup %1329  ;;  %1339 = vrcp.f32 %v1740_v26  ;;  %v487_v45 = vadd.f32 %v486_v25, %v1628_v15  ;;  %v585_v55 = vsub.f32 1.0, %v1732_v51  ;;  %v1780_v3 = vmul.f32 %v1755_v59, %v1693_v14 }
 0x141   :  { %v1332_v40 = vpop.eup %1331  ;;  %1341 = vrcp.f32 %v1758_v29  ;;  %v1239_v20 = vmul.f32 -1.442695, %v464_v52  ;;  %v686_v27 = vsel %vm1718_vm6, %v685_v12, %v681_v6  ;;  %v1794_v52 = vmul.f32 %v1765_v42, %v1699_v11 }
 0x142   :  { %v1776_v4 = vpop.eup %1333  ;;  %v1782_v39 = vadd.f32 1.0, %v1332_v40  ;;  %v1240_v15 = vmul.f32 -1.442695, %v487_v45  ;;  %v804_v40 = vadd.f32 %v1653_v22, %v686_v27  ;;  %v692_v12 = vadd.f32 %v1697_v7, %v691_v50 }
 0x143   :  { %v1336_v25 = vpop.eup %1335  ;;  %v704_v54 = vmul.f32 %v1776_v4, %v1711_v24  ;;  %1343 = vpow2.f32 %v1239_v20  ;;  %v557_v6 = vadd.f32 %v1646_v61, %v556_v31  ;;  %v571_v50 = vmul.f32 %v1651_v19, %v570_v21 }
 0x144   :  { %1345 = vrcp.f32 %v1782_v39  ;;  %v1808_v13 = vadd.f32 1.0, %v1336_v25  ;;  %v820_v30 = vmul.f32 %v804_v40, %v277_v38  ;;  %vm723_vm1 = vweird.f32 %v1738_v23 }
 0x145   :  { %v1812_v45 = vpop.eup %1337  ;;  %v705_v20 = vsub.f32 1.0, %v704_v54  ;;  %1347 = vpow2.f32 %v1240_v15  ;;  %v696_v54 = vsel %vm695_vm15, %v1697_v7, %v692_v12  ;;  %v561_v33 = vsel %vm1803_vm13, %v1646_v61, %v557_v6 }
 0x146   :  { %v1824_v27 = vpop.eup %1339  ;;  %v719_v31 = vmul.f32 %v1812_v45, %v1738_v23  ;;  %1349 = vrcp.f32 %v1808_v13  ;;  %892 = vmatpush.msra.mxu0 %v820_v30  ;;  %v701_v21 = vsel %vm1751_vm10, %v700_v16, %v696_v54  ;;  %v566_v15 = vsel %vm1726_vm7, %v1670_v44, %v561_v33 }
 0x147   :  { %v1833_v38 = vpop.eup %1341  ;;  %v706_v28 = vmul.f32 %v1776_v4, %v705_v20  ;;  %v734_v35 = vmul.f32 %v1824_v27, %v1740_v26  ;;  %v805_v25 = vadd.f32 %v1653_v22, %v701_v21  ;;  %v796_v40 = vadd.f32 %v1653_v22, %v566_v15 }
 0x148   :  { %v720_v7 = vsub.f32 1.0, %v719_v31  ;;  %v749_v61 = vmul.f32 %v1833_v38, %v1758_v29  ;;  %v615_v12 = vsub.f32 1.0, %v1780_v3  ;;  %v572_v53 = vadd.f32 %v1651_v19, %v571_v50 }
 0x149   :  { %v1344_v57 = vpop.eup %1343  ;;  %v735_v6 = vsub.f32 1.0, %v734_v35  ;;  %v2348_v20 = vmax.f32 %v1516_v37, 0.0  ;;  %v707_v54 = vadd.f32 %v1776_v4, %v706_v28  ;;  %v2351_v21 = vmax.f32 %v1505_v32, 0.0 }
 0x14a   :  { %v1851_v2 = vpop.eup %1345  ;;  %v750_v44 = vsub.f32 1.0, %v749_v61  ;;  %v1853_v16 = vadd.f32 1.0, %v1344_v57  ;;  %v721_v50 = vmul.f32 %v1812_v45, %v720_v7  ;;  %v576_v37 = vsel %vm1859_vm3, %v1651_v19, %v572_v53 }
 0x14b   :  { %v821_v30 = vmul.f32 %v805_v25, %v2348_v20  ;;  %v1348_v33 = vpop.eup %1347  ;;  %v1867_v35 = vmul.f32 %v1851_v2, %v1782_v39  ;;  %v812_v15 = vmul.f32 %v796_v40, %v2351_v21  ;;  %v630_v7 = vsub.f32 1.0, %v1794_v52 }
 0x14c   :  { %v1879_v28 = vpop.eup %1349  ;;  %v1883_v61 = vmul.f32 %v1824_v27, %v735_v6  ;;  %1351 = vrcp.f32 %v1853_v16  ;;  %v1886_v32 = vadd.f32 1.0, %v1348_v33  ;;  %v1889_v25 = vmul.f32 %v1833_v38, %v750_v44 }
 0x14d   :  { %924 = vmatpush.msra.mxu1 %v821_v30  ;;  %v1893_v19 = vmul.f32 %v1879_v28, %v1808_v13  ;;  %893 = vmatpush.msra.mxu0 %v812_v15  ;;  %v581_v40 = vsel %vm1788_vm12, %v1683_v18, %v576_v37  ;;  %vm709_vm4 = vweird.f32 %v1776_v4  ;;  %v645_v57 = vsub.f32 1.0, %v1867_v35 }
 0x14e   :  { %1353 = vrcp.f32 %v1886_v32  ;;  %v797_v6 = vadd.f32 %v1653_v22, %v581_v40  ;;  %1241 = vmatmul.msk.f32.vlgmr.msra.gmra.mxu0 %vm78_vm0, %v1877_v34  ;;  %vm1906_vm5 = vmor %vm708_vm14, %vm709_vm4  ;;  %v712_v17 = vand.u32 2147483647, %v1711_v24  ;;  %v714_v20 = vand.u32 2147483648, %v1711_v24 }
 0x14f   :  { %v660_v18 = vsub.f32 1.0, %v1893_v19  ;;  %v711_v44 = vsel %vm1906_vm5, %v1776_v4, %v707_v54  ;;  %v722_v30 = vadd.f32 %v1812_v45, %v721_v50  ;;  %v2354_v31 = vmax.f32 %v1513_v36, 0.0 }
 0x150   :  { %vm1919_vm6 = vcmp.eq.f32.partialorder %v712_v17, 8.507059e+37  ;;  %vm724_vm7 = vweird.f32 %v1812_v45  ;;  %v727_v15 = vand.u32 2147483647, %v1738_v23  ;;  %v715_v37 = vor.u32 1.1754944e-38, %v714_v20 }
 0x151   :  { %v813_v33 = vmul.f32 %v797_v6, %v2354_v31  ;;  %vm1927_vm8 = vmor %vm723_vm1, %vm724_vm7  ;;  %v729_v24 = vand.u32 2147483648, %v1738_v23  ;;  %v586_v36 = vmul.f32 %v1707_v41, %v585_v55  ;;  %vm588_vm9 = vweird.f32 %v1673_v46  ;;  %v1956_v55 = vld [vmem:[%s2317_s5 + $0x8] sm:$0xff] }
 0x152   :  { %v1936_v54 = vpop.eup %1351  ;;  %vm738_vm10 = vweird.f32 %v1740_v26  ;;  %v726_v50 = vsel %vm1927_vm8, %v1812_v45, %v722_v30  ;;  %vm1942_vm11 = vcmp.eq.f32.partialorder %v727_v15, 8.507059e+37  ;;  %vm589_vm12 = vweird.f32 %v1707_v41 }
 0x153   :  { %925 = vmatpush.msra.mxu1 %v813_v33  ;;  %v592_v51 = vand.u32 2147483647, %v1673_v46  ;;  %vm753_vm13 = vweird.f32 %v1758_v29  ;;  %v764_v23 = vmul.f32 %v1936_v54, %v1853_v16  ;;  %v716_v45 = vsel %vm1919_vm6, %v715_v37, %v711_v44  ;;  %vm1966_vm14 = vmor %vm588_vm9, %vm589_vm12 }
 0x154   :  { %1246 = vmatmul.msk.f32.vlgmr.msra.gmra.mxu1 %vm78_vm0, %v1877_v34  ;;  %v730_v6 = vor.u32 1.1754944e-38, %v729_v24  ;;  %v587_v53 = vadd.f32 %v1707_v41, %v586_v36  ;;  %v1961_v17 = vpop.eup %1353  ;;  %v806_v20 = vadd.f32 %v1653_v22, %v716_v45  ;;  %v594_v33 = vand.u32 2147483648, %v1673_v46 }
 0x155   :  { %vm1970_vm15 = vcmp.eq.f32.partialorder %v592_v51, 8.507059e+37  ;;  %v2365_v44 = vsub.f32 1.0, %v1736_v1  ;;  %v765_v15 = vsub.f32 1.0, %v764_v23  ;;  %v779_v37 = vmul.f32 %v1961_v17, %v1886_v32 }
 0x156   :  { %v731_v4 = vsel %vm1942_vm11, %v730_v6, %v726_v50  ;;  %v591_v24 = vsel %vm1966_vm14, %v1707_v41, %v587_v53  ;;  %1242 = vmatmul.msk.f32.gmra.mxu0 %vm78_vm0, %v1956_v55  ;;  %v2366_v46 = vmax.f32 %v1538_v48, 0.0  ;;  %v595_v51 = vor.u32 1.1754944e-38, %v594_v33 }
 0x157   :  { %v601_v21 = vmul.f32 %v1714_v56, %v2365_v44  ;;  %v807_v1 = vadd.f32 %v1653_v22, %v731_v4  ;;  %v1992_v45 = vmul.f32 %v1936_v54, %v765_v15  ;;  %v780_v40 = vsub.f32 1.0, %v779_v37  ;;  %v2034_v4 = vld [vmem:[%s2317_s5 + $0x10] sm:$0xff] }
 0x158   :  { %v822_v36 = vmul.f32 %v806_v20, %v2366_v46  ;;  %vm603_vm1 = vweird.f32 %v1676_v58  ;;  %vm604_vm2 = vweird.f32 %v1714_v56  ;;  %v2367_v41 = vmax.f32 %v1541_v49, 0.0 }
 0x159   :  { %v602_v23 = vadd.f32 %v1714_v56, %v601_v21  ;;  %v596_v48 = vsel %vm1970_vm15, %v595_v51, %v591_v24  ;;  %vm2000_vm3 = vmor %vm603_vm1, %vm604_vm2  ;;  %v607_v53 = vand.u32 2147483647, %v1676_v58  ;;  %v609_v20 = vand.u32 2147483648, %v1676_v58 }
 0x15a   :  { %956 = vmatpush.msra.mxu2 %v822_v36  ;;  %v823_v50 = vmul.f32 %v807_v1, %v2367_v41  ;;  %v2007_v30 = vmul.f32 %v1961_v17, %v780_v40  ;;  %v798_v33 = vadd.f32 %v1653_v22, %v596_v48  ;;  %v737_v31 = vadd.f32 %v1824_v27, %v1883_v61 }
 0x15b   :  { %v606_v49 = vsel %vm2000_vm3, %v1714_v56, %v602_v23  ;;  %vm608_vm4 = vcmp.eq.f32.partialorder %v607_v53, 8.507059e+37  ;;  %v610_v44 = vor.u32 1.1754944e-38, %v609_v20  ;;  %vm739_vm5 = vweird.f32 %v1824_v27  ;;  %v2109_v56 = vld [vmem:[%s2317_s5 + $0x18] sm:$0xff] }
 0x15c   :  { %988 = vmatpush.msra.mxu3 %v823_v50  ;;  %v742_v21 = vand.u32 2147483647, %v1740_v26  ;;  %1247 = vmatmul.msk.f32.gmra.mxu1 %vm78_vm0, %v1956_v55  ;;  %v2370_v58 = vmax.f32 %v1531_v43, 0.0  ;;  %vm2023_vm6 = vmor %vm738_vm10, %vm739_vm5  ;;  %v744_v61 = vand.u32 2147483648, %v1740_v26  ;;  %v752_v37 = vadd.f32 %v1833_v38, %v1889_v25 }
 0x15d   :  { %vm754_vm7 = vweird.f32 %v1833_v38  ;;  %vm768_vm8 = vweird.f32 %v1853_v16  ;;  %v611_v43 = vsel %vm608_vm4, %v610_v44, %v606_v49  ;;  %v741_v24 = vsel %vm2023_vm6, %v1824_v27, %v737_v31 }
 0x15e   :  { %v814_v15 = vmul.f32 %v798_v33, %v2370_v58  ;;  %vm2040_vm9 = vcmp.eq.f32.partialorder %v742_v21, 8.507059e+37  ;;  %vm2046_vm10 = vmor %vm753_vm13, %vm754_vm7  ;;  %v757_v25 = vand.u32 2147483647, %v1758_v29  ;;  %v799_v36 = vadd.f32 %v1653_v22, %v611_v43  ;;  %1243 = vmatmul.msk.f32.gmra.mxu0 %vm78_vm0, %v2034_v4 }
 0x15f   :  { %v745_v1 = vor.u32 1.1754944e-38, %v744_v61  ;;  %v756_v27 = vsel %vm2046_vm10, %v1833_v38, %v752_v37  ;;  %v759_v51 = vand.u32 2147483648, %v1758_v29  ;;  %v616_v23 = vmul.f32 %v1755_v59, %v615_v12 }
 0x160   :  { %957 = vmatpush.msra.mxu2 %v814_v15  ;;  %vm758_vm11 = vcmp.eq.f32.partialorder %v757_v25, 8.507059e+37  ;;  %vm618_vm12 = vweird.f32 %v1693_v14  ;;  %vm619_vm13 = vweird.f32 %v1755_v59  ;;  %vm783_vm14 = vweird.f32 %v1886_v32 }
 0x161   :  { %1251 = vmatmul.msk.f32.vlgmr.msra.gmra.mxu2 %vm78_vm0, %v1877_v34  ;;  %v2377_v38 = vmax.f32 %v1535_v47, 0.0  ;;  %v746_v40 = vsel %vm2040_vm9, %v745_v1, %v741_v24  ;;  %v760_v41 = vor.u32 1.1754944e-38, %v759_v51  ;;  %v622_v3 = vand.u32 2147483647, %v1693_v14  ;;  %vm2077_vm15 = vmor %vm618_vm12, %vm619_vm13 }
 0x162   :  { %v808_v12 = vadd.f32 %v1653_v22, %v746_v40  ;;  %v617_v50 = vadd.f32 %v1755_v59, %v616_v23  ;;  %v624_v48 = vand.u32 2147483648, %v1693_v14  ;;  %v631_v6 = vmul.f32 %v1765_v42, %v630_v7 }
 0x163   :  { %v815_v29 = vmul.f32 %v799_v36, %v2377_v38  ;;  %v761_v53 = vsel %vm758_vm11, %v760_v41, %v756_v27  ;;  %vm623_vm1 = vcmp.eq.f32.partialorder %v622_v3, 8.507059e+37  ;;  %vm633_vm2 = vweird.f32 %v1699_v11 }
 0x164   :  { %vm634_vm3 = vweird.f32 %v1765_v42  ;;  %v2380_v14 = vmax.f32 %v1570_v60, 0.0  ;;  %v809_v52 = vadd.f32 %v1653_v22, %v761_v53  ;;  %v621_v7 = vsel %vm2077_vm15, %v1755_v59, %v617_v50  ;;  %1248 = vmatmul.msk.f32.gmra.mxu1 %vm78_vm0, %v2034_v4  ;;  %v832_v50 = vld [vmem:[%s2317_s5 + $0x20] sm:$0xff] }
 0x165   :  { %989 = vmatpush.msra.mxu3 %v815_v29  ;;  %v625_v33 = vor.u32 1.1754944e-38, %v624_v48  ;;  %v632_v49 = vadd.f32 %v1765_v42, %v631_v6  ;;  %v637_v31 = vand.u32 2147483647, %v1699_v11  ;;  %v639_v44 = vand.u32 2147483648, %v1699_v11  ;;  %vm2102_vm4 = vmor %vm633_vm2, %vm634_vm3 }
 0x166   :  { %1256 = vmatmul.msk.f32.vlgmr.msra.gmra.mxu3 %vm78_vm0, %v1877_v34  ;;  %v824_v20 = vmul.f32 %v808_v12, %v2380_v14  ;;  %v767_v60 = vadd.f32 %v1936_v54, %v1992_v45  ;;  %v2381_v21 = vmax.f32 %v1578_v0, 0.0  ;;  %vm769_vm5 = vweird.f32 %v1936_v54  ;;  %1244 = vmatmul.msk.f32.gmra.mxu0 %vm78_vm0, %v2109_v56 }
 0x167   :  { %v626_v15 = vsel %vm623_vm1, %v625_v33, %v621_v7  ;;  %v772_v45 = vand.u32 2147483647, %v1853_v16  ;;  %v636_v0 = vsel %vm2102_vm4, %v1765_v42, %v632_v49  ;;  %vm638_vm6 = vcmp.eq.f32.partialorder %v637_v31, 8.507059e+37  ;;  %vm2119_vm7 = vmor %vm768_vm8, %vm769_vm5  ;;  %v833_v31 = vld [vmem:[%s2318_s6] sm:$0xff] }
 0x168   :  { %1020 = vmatpush.msrb.mxu0 %v824_v20  ;;  %v825_v58 = vmul.f32 %v809_v52, %v2381_v21  ;;  %v800_v61 = vadd.f32 %v1653_v22, %v626_v15  ;;  %v640_v11 = vor.u32 1.1754944e-38, %v639_v44  ;;  %v771_v43 = vsel %vm2119_vm7, %v1936_v54, %v767_v60  ;;  %840 = vperm.xlu2 %1290, %v833_v31  }
 0x169   :  { %1252 = vmatmul.msk.f32.gmra.mxu2 %vm78_vm0, %v1956_v55  ;;  %vm2128_vm9 = vcmp.eq.f32.partialorder %v772_v45, 8.507059e+37  ;;  %v774_v42 = vand.u32 2147483648, %v1853_v16  ;;  %v782_v46 = vadd.f32 %v1961_v17, %v2007_v30  ;;  %v2388_v26 = vmax.f32 %v1573_v62, 0.0  ;;  %v2264_v45 = vpop.permute.xlu0 %850 }
 0x16a   :  { %1052 = vmatpush.msrb.mxu1 %v825_v58  ;;  %v641_v36 = vsel %vm638_vm6, %v640_v11, %v636_v0  ;;  %vm784_vm8 = vweird.f32 %v1961_v17  ;;  %v787_v54 = vand.u32 2147483647, %v1886_v32  ;;  %v789_v62 = vand.u32 2147483648, %v1886_v32 }
 0x16b   :  { %v816_v25 = vmul.f32 %v800_v61, %v2388_v26  ;;  %v801_v1 = vadd.f32 %v1653_v22, %v641_v36  ;;  %v775_v27 = vor.u32 1.1754944e-38, %v774_v42  ;;  %vm2144_vm10 = vmor %vm783_vm14, %vm784_vm8  ;;  %v646_v30 = vmul.f32 %v1851_v2, %v645_v57  ;;  %v2269_v42 = vpop.permute.xlu1 %855 }
 0x16c   :  { %v786_v51 = vsel %vm2144_vm10, %v1961_v17, %v782_v46  ;;  %vm788_vm11 = vcmp.eq.f32.partialorder %v787_v54, 8.507059e+37  ;;  %vm648_vm12 = vweird.f32 %v1782_v39  ;;  %vm649_vm13 = vweird.f32 %v1851_v2  ;;  %1249 = vmatmul.msk.f32.gmra.mxu1 %vm78_vm0, %v2109_v56 }
 0x16d   :  { %1021 = vmatpush.msrb.mxu0 %v816_v25  ;;  %v2391_v23 = vmax.f32 %v1575_v63, 0.0  ;;  %v776_v35 = vsel %vm2128_vm9, %v775_v27, %v771_v43  ;;  %v790_v32 = vor.u32 1.1754944e-38, %v789_v62  ;;  %v647_v57 = vadd.f32 %v1851_v2, %v646_v30  ;;  %vm2167_vm14 = vmor %vm648_vm12, %vm649_vm13 }
 0x16e   :  { %1257 = vmatmul.msk.f32.gmra.mxu3 %vm78_vm0, %v1956_v55  ;;  %v810_v17 = vadd.f32 %v1653_v22, %v776_v35  ;;  %v652_v63 = vand.u32 2147483647, %v1782_v39  ;;  %v654_v40 = vand.u32 2147483648, %v1782_v39  ;;  %v661_v41 = vmul.f32 %v1879_v28, %v660_v18  ;;  %1245 = vmatmul.msk.f32.gmra.mxu0 %vm78_vm0, %v832_v50 }
 0x16f   :  { %v817_v38 = vmul.f32 %v801_v1, %v2391_v23  ;;  %v791_v3 = vsel %vm788_vm11, %v790_v32, %v786_v51  ;;  %v651_v12 = vsel %vm2167_vm14, %v1851_v2, %v647_v57  ;;  %vm664_vm15 = vweird.f32 %v1879_v28 }
 0x170   :  { %v2394_v48 = vmax.f32 %v1595_v9, 0.0  ;;  %v811_v39 = vadd.f32 %v1653_v22, %v791_v3  ;;  %v655_v19 = vor.u32 1.1754944e-38, %v654_v40  ;;  %vm663_vm1 = vweird.f32 %v1808_v13 }
 0x171   :  { %1053 = vmatpush.msrb.mxu1 %v817_v38  ;;  %vm653_vm2 = vcmp.eq.f32.partialorder %v652_v63, 8.507059e+37  ;;  %v662_v18 = vadd.f32 %v1879_v28, %v661_v41  ;;  %v667_v53 = vand.u32 2147483647, %v1808_v13  ;;  %v669_v2 = vand.u32 2147483648, %v1808_v13  ;;  %1253 = vmatmul.msk.f32.gmra.mxu2 %vm78_vm0, %v2034_v4  ;;  %vm665_vm3 = vmor %vm663_vm1, %vm664_vm15 }
 0x172   :  { %v826_v6 = vmul.f32 %v810_v17, %v2394_v48  ;;  %v2395_v47 = vmax.f32 %v1598_v10, 0.0  ;;  %v656_v14 = vsel %vm653_vm2, %v655_v19, %v651_v12  ;;  %v2396_v13 = vmax.f32 %v1588_v5, 0.0  ;;  %v834_v5 = vld [vmem:[%s2318_s6 + $0x8] sm:$0xff] }
 0x173   :  { %v802_v20 = vadd.f32 %v1653_v22, %v656_v14  ;;  %v666_v52 = vsel %vm665_vm3, %v1879_v28, %v662_v18  ;;  %v670_v7 = vor.u32 1.1754944e-38, %v669_v2  ;;  %vm668_vm4 = vcmp.eq.f32.partialorder %v667_v53, 8.507059e+37  ;;  %845 = vperm.xlu2 %1290, %v834_v5  }
 0x174   :  { %1084 = vmatpush.msrb.mxu2 %v826_v6  ;;  %v827_v9 = vmul.f32 %v811_v39, %v2395_v47  ;;  %1250 = vmatmul.msk.f32.gmra.mxu1 %vm78_vm0, %v832_v50  ;;  %v2397_v28 = vmax.f32 %v1592_v8, 0.0  ;;  %v837_v8 = vld [vmem:[%s2318_s6 + $0x20] sm:$0xff]  ;;  %s1411_s6 = smov [#allocation6]  }
 0x175   :  { %v818_v33 = vmul.f32 %v802_v20, %v2396_v13  ;;  %v671_v49 = vsel %vm668_vm4, %v670_v7, %v666_v52  ;;  %s1178_s1 = sshll.u32 %s1411_s6, 4  ;;  %s1179_s1 = int_to_ptr.vmem [resolvable:$true] %s1178_s1 }
 0x176   :  { %1116 = vmatpush.msrb.mxu3 %v827_v9  ;;  %v803_v10 = vadd.f32 %v1653_v22, %v671_v49  ;;  %1261 = vmatmul.msk.f32.vlgmr.msrb.gmra.mxu0 %vm78_vm0, %v1877_v34 }
 0x177   :  { %1258 = vmatmul.msk.f32.gmra.mxu3 %vm78_vm0, %v2034_v4  ;;  %1085 = vmatpush.msrb.mxu2 %v818_v33 }
 0x178   :  { %v819_v44 = vmul.f32 %v803_v10, %v2397_v28 }
 0x179   :  { %1254 = vmatmul.msk.f32.gmra.mxu2 %vm78_vm0, %v2109_v56 }
 0x17a   :  { %1117 = vmatpush.msrb.mxu3 %v819_v44 }
 0x17b   :  { %860 = vperm.xlu2 %1290, %v837_v8  }
 0x17c   :  { %1266 = vmatmul.msk.f32.vlgmr.msrb.gmra.mxu1 %vm78_vm0, %v1877_v34 }
 0x17e   :  { %1262 = vmatmul.msk.f32.gmra.mxu0 %vm78_vm0, %v1956_v55 }
 0x17f   :  { %1259 = vmatmul.msk.f32.gmra.mxu3 %vm78_vm0, %v2109_v56 }
 0x181   :  { %1255 = vmatmul.msk.f32.gmra.mxu2 %vm78_vm0, %v832_v50 }
 0x184   :  { %1267 = vmatmul.msk.f32.gmra.mxu1 %vm78_vm0, %v1956_v55 }
 0x186   :  { %1263 = vmatmul.msk.f32.gmra.mxu0 %vm78_vm0, %v2034_v4 }
 0x187   :  { %1260 = vmatmul.msk.f32.gmra.mxu3 %vm78_vm0, %v832_v50 }
 0x189   :  { %1271 = vmatmul.msk.f32.vlgmr.msrb.gmra.mxu2 %vm78_vm0, %v1877_v34 }
 0x18c   :  { %1268 = vmatmul.msk.f32.gmra.mxu1 %vm78_vm0, %v2034_v4 }
 0x18e   :  { %1264 = vmatmul.msk.f32.gmra.mxu0 %vm78_vm0, %v2109_v56 }
 0x18f   :  { %1276 = vmatmul.msk.f32.vlgmr.msrb.gmra.mxu3 %vm78_vm0, %v1877_v34 }
 0x191   :  { %1272 = vmatmul.msk.f32.gmra.mxu2 %vm78_vm0, %v1956_v55 }
 0x194   :  { %1269 = vmatmul.msk.f32.gmra.mxu1 %vm78_vm0, %v2109_v56 }
 0x196   :  { %1265 = vmatmul.msk.f32.gmra.mxu0 %vm78_vm0, %v832_v50 }
 0x197   :  { %1277 = vmatmul.msk.f32.gmra.mxu3 %vm78_vm0, %v1956_v55 }
 0x199   :  { %1273 = vmatmul.msk.f32.gmra.mxu2 %vm78_vm0, %v2034_v4 }
 0x19c   :  { %1270 = vmatmul.msk.f32.gmra.mxu1 %vm78_vm0, %v832_v50 }
 0x19f   :  { %1278 = vmatmul.msk.f32.gmra.mxu3 %vm78_vm0, %v2034_v4 }
 0x1a1   :  { %1274 = vmatmul.msk.f32.gmra.mxu2 %vm78_vm0, %v2109_v56 }
 0x1a7   :  { %1279 = vmatmul.msk.f32.gmra.mxu3 %vm78_vm0, %v2109_v56 }
 0x1a9   :  { %1275 = vmatmul.msk.f32.gmra.mxu2 %vm78_vm0, %v832_v50 }
 0x1af   :  { %1280 = vmatmul.msk.f32.gmra.mxu3 %vm78_vm0, %v832_v50 }
 0x1c2   :  { %v2256_v34 = vpop.permute.xlu2 %840 }
 0x1cb   :  { %v895_v22 = vpop.f32.mrf.mxu0 }
 0x1cc   :  { %v896_v55 = vadd.f32 %v895_v22, %v2256_v34 }
 0x1cd   :  { %v2260_v15 = vpop.permute.xlu2 %845 }
 0x1ce   :  { %1134 = vst [vmem:[#allocation6] sm:$0xff] %v896_v55 }
 0x1d1   :  { %v927_v60 = vpop.f32.mrf.mxu1 }
 0x1d2   :  { %v928_v4 = vadd.f32 %v927_v60, %v2256_v34 }
 0x1d3   :  { %v898_v21 = vpop.f32.mrf.mxu0 }
 0x1d4   :  { %1135 = vst [vmem:[#allocation6 + $0x8] sm:$0xff] %v928_v4  ;;  %v899_v59 = vadd.f32 %v898_v21, %v2260_v15 }
 0x1d5   :  { %v2276_v38 = vpop.permute.xlu2 %860 }
 0x1d6   :  { %1142 = vst [vmem:[#allocation6 + $0x40] sm:$0xff] %v899_v59 }
 0x1d9   :  { %v930_v58 = vpop.f32.mrf.mxu1 }
 0x1da   :  { %v931_v56 = vadd.f32 %v930_v58, %v2260_v15 }
 0x1db   :  { %v901_v61 = vpop.f32.mrf.mxu0 }
 0x1dc   :  { %v902_v0 = vadd.f32 %v901_v61, %v2264_v45  ;;  %1143 = vst [vmem:[#allocation6 + $0x48] sm:$0xff] %v931_v56 }
 0x1de   :  { %1150 = vst [vmem:[#allocation6 + $0x80] sm:$0xff] %v902_v0 }
 0x1e1   :  { %v933_v11 = vpop.f32.mrf.mxu1 }
 0x1e2   :  { %v934_v37 = vadd.f32 %v933_v11, %v2264_v45 }
 0x1e3   :  { %v904_v46 = vpop.f32.mrf.mxu0 }
 0x1e4   :  { %v959_v43 = vpop.f32.mrf.mxu2  ;;  %1151 = vst [vmem:[#allocation6 + $0x88] sm:$0xff] %v934_v37  ;;  %v905_v25 = vadd.f32 %v904_v46, %v2269_v42 }
 0x1e5   :  { %v960_v24 = vadd.f32 %v959_v43, %v2256_v34 }
 0x1e6   :  { %1158 = vst [vmem:[#allocation6 + $0xc0] sm:$0xff] %v905_v25 }
 0x1e7   :  { %1136 = vst [vmem:[#allocation6 + $0x10] sm:$0xff] %v960_v24 }
 0x1e9   :  { %v991_v26 = vpop.f32.mrf.mxu3  ;;  %v936_v54 = vpop.f32.mrf.mxu1 }
 0x1ea   :  { %v992_v36 = vadd.f32 %v991_v26, %v2256_v34  ;;  %v937_v1 = vadd.f32 %v936_v54, %v2269_v42 }
 0x1eb   :  { %v907_v62 = vpop.f32.mrf.mxu0 }
 0x1ec   :  { %1137 = vst [vmem:[#allocation6 + $0x18] sm:$0xff] %v992_v36  ;;  %v962_v27 = vpop.f32.mrf.mxu2  ;;  %v908_v32 = vadd.f32 %v907_v62, %v2276_v38 }
 0x1ed   :  { %v963_v16 = vadd.f32 %v962_v27, %v2260_v15  ;;  %1159 = vst [vmem:[#allocation6 + $0xc8] sm:$0xff] %v937_v1 }
 0x1ee   :  { %1166 = vst [vmem:[#allocation6 + $0x100] sm:$0xff] %v908_v32 }
 0x1ef   :  { %1144 = vst [vmem:[#allocation6 + $0x50] sm:$0xff] %v963_v16 }
 0x1f1   :  { %v994_v30 = vpop.f32.mrf.mxu3  ;;  %v939_v23 = vpop.f32.mrf.mxu1 }
 0x1f2   :  { %v995_v51 = vadd.f32 %v994_v30, %v2260_v15  ;;  %v940_v57 = vadd.f32 %v939_v23, %v2276_v38 }
 0x1f3   :  { %v1023_v29 = vpop.f32.mrf.mxu0 }
 0x1f4   :  { %1145 = vst [vmem:[#allocation6 + $0x58] sm:$0xff] %v995_v51  ;;  %v965_v35 = vpop.f32.mrf.mxu2  ;;  %v1024_v40 = vadd.f32 %v1023_v29, %v2256_v34 }
 0x1f5   :  { %v966_v17 = vadd.f32 %v965_v35, %v2264_v45  ;;  %1167 = vst [vmem:[#allocation6 + $0x108] sm:$0xff] %v940_v57 }
 0x1f6   :  { %1138 = vst [vmem:[#allocation6 + $0x20] sm:$0xff] %v1024_v40 }
 0x1f7   :  { %1152 = vst [vmem:[#allocation6 + $0x90] sm:$0xff] %v966_v17 }
 0x1f9   :  { %v1055_v3 = vpop.f32.mrf.mxu1 }
 0x1fa   :  { %v997_v63 = vpop.f32.mrf.mxu3  ;;  %v1056_v12 = vadd.f32 %v1055_v3, %v2256_v34 }
 0x1fb   :  { %v998_v41 = vadd.f32 %v997_v63, %v2264_v45  ;;  %v1026_v6 = vpop.f32.mrf.mxu0 }
 0x1fc   :  { %v968_v50 = vpop.f32.mrf.mxu2  ;;  %1139 = vst [vmem:[#allocation6 + $0x28] sm:$0xff] %v1056_v12  ;;  %v1027_v19 = vadd.f32 %v1026_v6, %v2260_v15 }
 0x1fd   :  { %1153 = vst [vmem:[#allocation6 + $0x98] sm:$0xff] %v998_v41  ;;  %v969_v48 = vadd.f32 %v968_v50, %v2269_v42 }
 0x1fe   :  { %1146 = vst [vmem:[#allocation6 + $0x60] sm:$0xff] %v1027_v19 }
 0x1ff   :  { %1160 = vst [vmem:[#allocation6 + $0xd0] sm:$0xff] %v969_v48 }
 0x201   :  { %v1058_v53 = vpop.f32.mrf.mxu1 }
 0x202   :  { %v1000_v39 = vpop.f32.mrf.mxu3  ;;  %v1059_v2 = vadd.f32 %v1058_v53, %v2260_v15 }
 0x203   :  { %v1001_v18 = vadd.f32 %v1000_v39, %v2269_v42  ;;  %v1029_v14 = vpop.f32.mrf.mxu0 }
 0x204   :  { %v971_v47 = vpop.f32.mrf.mxu2  ;;  %1147 = vst [vmem:[#allocation6 + $0x68] sm:$0xff] %v1059_v2  ;;  %v1030_v52 = vadd.f32 %v1029_v14, %v2264_v45 }
 0x205   :  { %1161 = vst [vmem:[#allocation6 + $0xd8] sm:$0xff] %v1001_v18  ;;  %v972_v9 = vadd.f32 %v971_v47, %v2276_v38 }
 0x206   :  { %1154 = vst [vmem:[#allocation6 + $0xa0] sm:$0xff] %v1030_v52 }
 0x207   :  { %1168 = vst [vmem:[#allocation6 + $0x110] sm:$0xff] %v972_v9 }
 0x209   :  { %v1061_v13 = vpop.f32.mrf.mxu1 }
 0x20a   :  { %v1003_v20 = vpop.f32.mrf.mxu3  ;;  %v1062_v33 = vadd.f32 %v1061_v13, %v2264_v45 }
 0x20b   :  { %v1004_v7 = vadd.f32 %v1003_v20, %v2276_v38  ;;  %v1032_v31 = vpop.f32.mrf.mxu0 }
 0x20c   :  { %v1087_v49 = vpop.f32.mrf.mxu2  ;;  %1155 = vst [vmem:[#allocation6 + $0xa8] sm:$0xff] %v1062_v33  ;;  %v1033_v44 = vadd.f32 %v1032_v31, %v2269_v42 }
 0x20d   :  { %1169 = vst [vmem:[#allocation6 + $0x118] sm:$0xff] %v1004_v7  ;;  %v1088_v10 = vadd.f32 %v1087_v49, %v2256_v34 }
 0x20e   :  { %1162 = vst [vmem:[#allocation6 + $0xe0] sm:$0xff] %v1033_v44 }
 0x20f   :  { %1140 = vst [vmem:[#allocation6 + $0x30] sm:$0xff] %v1088_v10 }
 0x211   :  { %v1064_v8 = vpop.f32.mrf.mxu1 }
 0x212   :  { %v1119_v28 = vpop.f32.mrf.mxu3  ;;  %v1065_v22 = vadd.f32 %v1064_v8, %v2269_v42 }
 0x213   :  { %v1120_v5 = vadd.f32 %v1119_v28, %v2256_v34  ;;  %v1035_v4 = vpop.f32.mrf.mxu0 }
 0x214   :  { %v1090_v55 = vpop.f32.mrf.mxu2  ;;  %1163 = vst [vmem:[#allocation6 + $0xe8] sm:$0xff] %v1065_v22  ;;  %v1036_v58 = vadd.f32 %v1035_v4, %v2276_v38 }
 0x215   :  { %1141 = vst [vmem:[#allocation6 + $0x38] sm:$0xff] %v1120_v5  ;;  %v1091_v60 = vadd.f32 %v1090_v55, %v2260_v15 }
 0x216   :  { %1170 = vst [vmem:[#allocation6 + $0x120] sm:$0xff] %v1036_v58 }
 0x217   :  { %1148 = vst [vmem:[#allocation6 + $0x70] sm:$0xff] %v1091_v60 }
 0x219   :  { %v1067_v56 = vpop.f32.mrf.mxu1 }
 0x21a   :  { %v1122_v21 = vpop.f32.mrf.mxu3  ;;  %v1068_v61 = vadd.f32 %v1067_v56, %v2276_v38 }
 0x21b   :  { %v1123_v59 = vadd.f32 %v1122_v21, %v2260_v15 }
 0x21c   :  { %v1093_v34 = vpop.f32.mrf.mxu2  ;;  %1171 = vst [vmem:[#allocation6 + $0x128] sm:$0xff] %v1068_v61 }
 0x21d   :  { %1149 = vst [vmem:[#allocation6 + $0x78] sm:$0xff] %v1123_v59  ;;  %v1094_v0 = vadd.f32 %v1093_v34, %v2264_v45 }
 0x21f   :  { %1156 = vst [vmem:[#allocation6 + $0xb0] sm:$0xff] %v1094_v0 }
 0x222   :  { %v1125_v11 = vpop.f32.mrf.mxu3 }
 0x223   :  { %v1126_v37 = vadd.f32 %v1125_v11, %v2264_v45 }
 0x224   :  { %v1096_v43 = vpop.f32.mrf.mxu2 }
 0x225   :  { %1157 = vst [vmem:[#allocation6 + $0xb8] sm:$0xff] %v1126_v37  ;;  %v1097_v24 = vadd.f32 %v1096_v43, %v2269_v42 }
 0x227   :  { %1164 = vst [vmem:[#allocation6 + $0xf0] sm:$0xff] %v1097_v24 }
 0x22a   :  { %v1128_v46 = vpop.f32.mrf.mxu3 }
 0x22b   :  { %v1129_v15 = vadd.f32 %v1128_v46, %v2269_v42 }
 0x22c   :  { %v1099_v26 = vpop.f32.mrf.mxu2 }
 0x22d   :  { %1165 = vst [vmem:[#allocation6 + $0xf8] sm:$0xff] %v1129_v15  ;;  %v1100_v25 = vadd.f32 %v1099_v26, %v2276_v38 }
 0x22f   :  { %1172 = vst [vmem:[#allocation6 + $0x130] sm:$0xff] %v1100_v25 }
 0x232   :  { %v1131_v45 = vpop.f32.mrf.mxu3 }
 0x233   :  { %v1132_v36 = vadd.f32 %v1131_v45, %v2276_v38 }
 0x235   :  { %1173 = vst [vmem:[#allocation6 + $0x138] sm:$0xff] %v1132_v36 }
 0x236   :  { %1186 = dma.vmem_to_hbm [thread:$0]  %s1179_s1, 5120, %s1181_s23, [#allocation5], %s1408_s12, %s1408_s12, %s1409_s13  }
 0x237   :  { %1405 = dma.done.wait [#allocation5], 5120  }
 0x238   :  { %1406 = vsyncadd [#allocation5], 4294962176 }
 0x239   :  { %1191 = vsyncpa [#allocation4], 1 }
 0x23a   :  { %1192 = vsyncpa [#allocation5], 1 }

</bundles_post_ra>
